<compile_context>
chip_gen: v7x
topology: tpu7x:2x2x1
jax: 0.10.0
libtpu: 0.0.40
codegen_flags: <defaults>
</compile_context>

<pallas_src>
import math

import jax
import jax.numpy as jnp
from jax.experimental import pallas as pl
from jax.experimental.pallas import tpu as pltpu


# ----------------------------------------------------------------------------
# Fused kernel: LSTM stack (time loop unrolled in-kernel) + MLP head.
# ----------------------------------------------------------------------------
def _make_fused_kernel(S, B, H, num_layers):
    def kernel(x_ref, *refs):
        # refs: per LSTM layer (w_ih_t, w_hh_t, b), then fc1/fc2/fc3 params,
        # then the single (B, 1) output ref.
        lstm_refs = refs[: 3 * num_layers]
        (w1_ref, b1_ref, w2_ref, b2_ref, w3_ref, b3_ref) = refs[
            3 * num_layers : 3 * num_layers + 6
        ]
        out_ref = refs[3 * num_layers + 6]
        f32 = jnp.float32

        # Layer-0 input projection hoisted out of the recurrence:
        # one (S*B, I) x (I, 4H) matmul instead of S tiny ones.  Bias is added
        # here once (not re-broadcast per timestep).
        xproj0 = (
            jnp.dot(x_ref[...], lstm_refs[0][...], preferred_element_type=f32)
            + lstm_refs[2][...]
        )  # (S*B, 4H), rows are time-major (row = t*B + b)

        prev_outs = None
        for l in range(num_layers):
            w_hh = lstm_refs[3 * l + 1][...]           # (H, 4H)
            if l > 0:
                w_ih = lstm_refs[3 * l][...]           # (H, 4H)
                b = lstm_refs[3 * l + 2][...]          # (1, 4H)
            h = jnp.zeros((B, H), f32)
            c = jnp.zeros((B, H), f32)
            outs = []
            for t in range(S):                         # fully unrolled recurrence
                if l == 0:
                    xg = xproj0[t * B:(t + 1) * B, :]
                else:
                    # Off this layer's h/c dependence chain -> overlaps.
                    xg = jnp.dot(prev_outs[t], w_ih, preferred_element_type=f32) + b
                gates = xg + jnp.dot(h, w_hh, preferred_element_type=f32)  # (B, 4H)
                # Gates repacked as [i, f, o | g]: one sigmoid, one tanh.
                sig = jax.nn.sigmoid(gates[:, : 3 * H])
                g_g = jnp.tanh(gates[:, 3 * H:])
                c = sig[:, H:2 * H] * c + sig[:, :H] * g_g     # f*c + i*g
                h = sig[:, 2 * H:3 * H] * jnp.tanh(c)          # o*tanh(c)
                outs.append(h)
            prev_outs = outs

        # MLP head.  fc1(out.reshape(B, S*H)) decomposed over time blocks so the
        # flattened slab never has to be materialized / stored.
        n1 = w1_ref.shape[1]
        acc = jnp.zeros((B, n1), f32)
        for t in range(S):
            acc = acc + jnp.dot(
                prev_outs[t], w1_ref[t * H:(t + 1) * H, :],
                preferred_element_type=f32,
            )
        h1 = jnp.maximum(acc + b1_ref[...], 0.0)
        h2 = jnp.maximum(
            jnp.dot(h1, w2_ref[...], preferred_element_type=f32) + b2_ref[...], 0.0
        )
        # fc3 (64 -> 1): VPU multiply + lane reduction (avoid an N=1 MXU matmul).
        h3 = jnp.sum(h2 * w3_ref[...], axis=-1, keepdims=True) + b3_ref[...]
        out_ref[...] = jax.nn.sigmoid(h3).astype(out_ref.dtype)

    return kernel


def _repack_gates(w, H):
    """Reorder the 4H gate axis (axis 0) from PyTorch [i, f, g, o] to [i, f, o, g]."""
    i, f, g, o = jnp.split(w, 4, axis=0)
    return jnp.concatenate([i, f, o, g], axis=0)


# ----------------------------------------------------------------------------
# Full module forward (single fused pallas_call).
# ----------------------------------------------------------------------------
def lstm_module_forward(x_bsi, params):
    """x_bsi: (B, S, input_size), batch_first like the PyTorch module."""
    B, S, I = x_bsi.shape
    layers = params["lstm_layers"]
    num_layers = len(layers)
    H = layers[0]["w_hh"].shape[1]

    # Time-major flatten of the input: row t*B + b == x[b, t, :].
    x_flat = jnp.transpose(x_bsi.astype(jnp.float32), (1, 0, 2)).reshape(S * B, I)

    args = [x_flat]
    for lp in layers:
        w_ih = _repack_gates(jnp.asarray(lp["w_ih"], jnp.float32), H)      # (4H, in)
        w_hh = _repack_gates(jnp.asarray(lp["w_hh"], jnp.float32), H)      # (4H, H)
        b = _repack_gates(
            jnp.asarray(lp["b_ih"] + lp["b_hh"], jnp.float32), H
        ).reshape(1, 4 * H)
        args += [w_ih.T, w_hh.T, b]
    args += [
        jnp.asarray(params["fc1_w"], jnp.float32).T,                       # (S*H, 128)
        jnp.asarray(params["fc1_b"], jnp.float32).reshape(1, -1),
        jnp.asarray(params["fc2_w"], jnp.float32).T,                       # (128, 64)
        jnp.asarray(params["fc2_b"], jnp.float32).reshape(1, -1),
        jnp.asarray(params["fc3_w"], jnp.float32).reshape(1, -1),          # (1, 64)
        jnp.asarray(params["fc3_b"], jnp.float32).reshape(1, 1),
    ]

    kernel = _make_fused_kernel(S=S, B=B, H=H, num_layers=num_layers)
    return pl.pallas_call(
        kernel,
        out_shape=jax.ShapeDtypeStruct((B, 1), jnp.float32),
        in_specs=[pl.BlockSpec(memory_space=pltpu.MemorySpace.VMEM)] * len(args),
        out_specs=pl.BlockSpec(memory_space=pltpu.MemorySpace.VMEM),
    )(*args)


# ----------------------------------------------------------------------------
# Pure-JAX reference (for correctness validation only).
# ----------------------------------------------------------------------------
def reference_forward(x_bsi, params):
    B = x_bsi.shape[0]
    seq = x_bsi.astype(jnp.float32)
    for lp in params["lstm_layers"]:
        H = lp["w_hh"].shape[1]
        w_ih, w_hh = lp["w_ih"], lp["w_hh"]
        b = lp["b_ih"] + lp["b_hh"]

        def step(carry, x_t, w_ih=w_ih, w_hh=w_hh, b=b):
            h, c = carry
            gates = x_t @ w_ih.T + h @ w_hh.T + b
            i, f, g, o = jnp.split(gates, 4, axis=-1)
            i, f, o = jax.nn.sigmoid(i), jax.nn.sigmoid(f), jax.nn.sigmoid(o)
            g = jnp.tanh(g)
            c = f * c + i * g
            h = o * jnp.tanh(c)
            return (h, c), h

        init = (jnp.zeros((B, H), jnp.float32), jnp.zeros((B, H), jnp.float32))
        _, ys = jax.lax.scan(step, init, jnp.transpose(seq, (1, 0, 2)))
        seq = jnp.transpose(ys, (1, 0, 2))
    flat = seq.reshape(B, -1)
    h1 = jax.nn.relu(flat @ params["fc1_w"].T + params["fc1_b"])
    h2 = jax.nn.relu(h1 @ params["fc2_w"].T + params["fc2_b"])
    return jax.nn.sigmoid(h2 @ params["fc3_w"].T + params["fc3_b"])


# ----------------------------------------------------------------------------
# Deterministic parameter init (PyTorch-style uniform bounds, synthetic values).
# ----------------------------------------------------------------------------
def init_params(key, input_size, hidden_size, sequence_length, num_layers):
    def uniform(k, shape, bound):
        return jax.random.uniform(k, shape, jnp.float32, -bound, bound)

    keys = jax.random.split(key, 4 * num_layers + 6)
    ki = iter(range(len(keys)))

    lstm_layers = []
    stdv = 1.0 / math.sqrt(hidden_size)
    for layer in range(num_layers):
        in_sz = input_size if layer == 0 else hidden_size
        lstm_layers.append(dict(
            w_ih=uniform(keys[next(ki)], (4 * hidden_size, in_sz), stdv),
            w_hh=uniform(keys[next(ki)], (4 * hidden_size, hidden_size), stdv),
            b_ih=uniform(keys[next(ki)], (4 * hidden_size,), stdv),
            b_hh=uniform(keys[next(ki)], (4 * hidden_size,), stdv),
        ))

    fc1_in = hidden_size * sequence_length
    p = dict(lstm_layers=lstm_layers)
    p["fc1_w"] = uniform(keys[next(ki)], (128, fc1_in), 1.0 / math.sqrt(fc1_in))
    p["fc1_b"] = uniform(keys[next(ki)], (128,), 1.0 / math.sqrt(fc1_in))
    p["fc2_w"] = uniform(keys[next(ki)], (64, 128), 1.0 / math.sqrt(128))
    p["fc2_b"] = uniform(keys[next(ki)], (64,), 1.0 / math.sqrt(128))
    p["fc3_w"] = uniform(keys[next(ki)], (1, 64), 1.0 / math.sqrt(64))
    p["fc3_b"] = uniform(keys[next(ki)], (1,), 1.0 / math.sqrt(64))
    return p


if __name__ == "__main__":
    # Small shapes consistent with the module's forward.
    batch = 2
    input_size = 4
    hidden_size = 32
    sequence_length = 8
    num_layers = 2

    key = jax.random.PRNGKey(0)
    k_x, k_p = jax.random.split(key)
    x = jax.random.normal(k_x, (batch, sequence_length, input_size), jnp.float32)
    params = init_params(k_p, input_size, hidden_size, sequence_length, num_layers)

    forward = jax.jit(lstm_module_forward)
    out = jax.block_until_ready(forward(x, params))

    assert out.shape == (batch, 1)
    assert bool(jnp.all((out >= 0.0) & (out <= 1.0)))

    ref = jax.block_until_ready(reference_forward(x, params))
    max_err = float(jnp.max(jnp.abs(out - ref)))
    assert max_err < 3e-2, f"kernel/reference mismatch: max abs err = {max_err}"

    print("KERNEL_OK")
</pallas_src>

<mosaic_0001>
module attributes {stable_mosaic.version = 11 : i64} {
  func.func @kernel(%arg0: memref<16x4xf32, #tpu.memory_space<vmem>>, %arg1: memref<4x128xf32, #tpu.memory_space<vmem>>, %arg2: memref<32x128xf32, #tpu.memory_space<vmem>>, %arg3: memref<1x128xf32, #tpu.memory_space<vmem>>, %arg4: memref<32x128xf32, #tpu.memory_space<vmem>>, %arg5: memref<32x128xf32, #tpu.memory_space<vmem>>, %arg6: memref<1x128xf32, #tpu.memory_space<vmem>>, %arg7: memref<256x128xf32, #tpu.memory_space<vmem>>, %arg8: memref<1x128xf32, #tpu.memory_space<vmem>>, %arg9: memref<128x64xf32, #tpu.memory_space<vmem>>, %arg10: memref<1x64xf32, #tpu.memory_space<vmem>>, %arg11: memref<1x64xf32, #tpu.memory_space<vmem>>, %arg12: memref<1x1xf32, #tpu.memory_space<vmem>>, %arg13: memref<2x1xf32, #tpu.memory_space<vmem>>) attributes {dimension_semantics = [], scalar_prefetch = 0 : i64, scratch_operands = 0 : i64, tpu.core_type = #tpu.core_type<tc>} {
    %c0 = arith.constant 0 : index
    %c0_0 = arith.constant 0 : index
    %0 = vector.load %arg0[%c0, %c0_0] : memref<16x4xf32, #tpu.memory_space<vmem>>, vector<16x4xf32>
    %c0_1 = arith.constant 0 : index
    %c0_2 = arith.constant 0 : index
    %1 = vector.load %arg1[%c0_1, %c0_2] : memref<4x128xf32, #tpu.memory_space<vmem>>, vector<4x128xf32>
    %cst = arith.constant dense<0.000000e+00> : vector<16x128xf32>
    %2 = tpu.matmul %0, %1, %cst {dimension_numbers = #tpu.dot_dimension_numbers<[1], [0], [0], [1], [0, 0, 1, 1], [], []>} : vector<16x4xf32>, vector<4x128xf32>, vector<16x128xf32> -> vector<16x128xf32>
    %c0_3 = arith.constant 0 : index
    %c0_4 = arith.constant 0 : index
    %3 = vector.load %arg3[%c0_3, %c0_4] : memref<1x128xf32, #tpu.memory_space<vmem>>, vector<1x128xf32>
    %4 = vector.broadcast %3 : vector<1x128xf32> to vector<16x128xf32>
    %5 = arith.addf %2, %4 : vector<16x128xf32>
    %c0_5 = arith.constant 0 : index
    %c0_6 = arith.constant 0 : index
    %6 = vector.load %arg2[%c0_5, %c0_6] : memref<32x128xf32, #tpu.memory_space<vmem>>, vector<32x128xf32>
    %cst_7 = arith.constant 0.000000e+00 : f32
    %7 = vector.broadcast %cst_7 : f32 to vector<2x32xf32>
    %cst_8 = arith.constant 0.000000e+00 : f32
    %8 = vector.broadcast %cst_8 : f32 to vector<2x32xf32>
    %9 = vector.extract_strided_slice %5 {offsets = [0, 0], sizes = [2, 128], strides = [1, 1]} : vector<16x128xf32> to vector<2x128xf32>
    %cst_9 = arith.constant dense<0.000000e+00> : vector<2x128xf32>
    %10 = tpu.matmul %7, %6, %cst_9 {dimension_numbers = #tpu.dot_dimension_numbers<[1], [0], [0], [1], [0, 0, 1, 1], [], []>} : vector<2x32xf32>, vector<32x128xf32>, vector<2x128xf32> -> vector<2x128xf32>
    %11 = arith.addf %9, %10 : vector<2x128xf32>
    %12 = vector.extract_strided_slice %11 {offsets = [0, 0], sizes = [2, 96], strides = [1, 1]} : vector<2x128xf32> to vector<2x96xf32>
    %13 = arith.negf %12 : vector<2x96xf32>
    %14 = math.exp %13 : vector<2x96xf32>
    %cst_10 = arith.constant 1.000000e+00 : f32
    %15 = vector.broadcast %cst_10 : f32 to vector<2x96xf32>
    %16 = arith.addf %15, %14 : vector<2x96xf32>
    %17 = arith.divf %15, %16 : vector<2x96xf32>
    %18 = vector.extract_strided_slice %11 {offsets = [0, 96], sizes = [2, 32], strides = [1, 1]} : vector<2x128xf32> to vector<2x32xf32>
    %19 = math.tanh %18 : vector<2x32xf32>
    %20 = vector.extract_strided_slice %17 {offsets = [0, 32], sizes = [2, 32], strides = [1, 1]} : vector<2x96xf32> to vector<2x32xf32>
    %21 = arith.mulf %20, %8 : vector<2x32xf32>
    %22 = vector.extract_strided_slice %17 {offsets = [0, 0], sizes = [2, 32], strides = [1, 1]} : vector<2x96xf32> to vector<2x32xf32>
    %23 = arith.mulf %22, %19 : vector<2x32xf32>
    %24 = arith.addf %21, %23 : vector<2x32xf32>
    %25 = vector.extract_strided_slice %17 {offsets = [0, 64], sizes = [2, 32], strides = [1, 1]} : vector<2x96xf32> to vector<2x32xf32>
    %26 = math.tanh %24 : vector<2x32xf32>
    %27 = arith.mulf %25, %26 : vector<2x32xf32>
    %28 = vector.extract_strided_slice %5 {offsets = [2, 0], sizes = [2, 128], strides = [1, 1]} : vector<16x128xf32> to vector<2x128xf32>
    %cst_11 = arith.constant dense<0.000000e+00> : vector<2x128xf32>
    %29 = tpu.matmul %27, %6, %cst_11 {dimension_numbers = #tpu.dot_dimension_numbers<[1], [0], [0], [1], [0, 0, 1, 1], [], []>} : vector<2x32xf32>, vector<32x128xf32>, vector<2x128xf32> -> vector<2x128xf32>
    %30 = arith.addf %28, %29 : vector<2x128xf32>
    %31 = vector.extract_strided_slice %30 {offsets = [0, 0], sizes = [2, 96], strides = [1, 1]} : vector<2x128xf32> to vector<2x96xf32>
    %32 = arith.negf %31 : vector<2x96xf32>
    %33 = math.exp %32 : vector<2x96xf32>
    %cst_12 = arith.constant 1.000000e+00 : f32
    %34 = vector.broadcast %cst_12 : f32 to vector<2x96xf32>
    %35 = arith.addf %34, %33 : vector<2x96xf32>
    %36 = arith.divf %34, %35 : vector<2x96xf32>
    %37 = vector.extract_strided_slice %30 {offsets = [0, 96], sizes = [2, 32], strides = [1, 1]} : vector<2x128xf32> to vector<2x32xf32>
    %38 = math.tanh %37 : vector<2x32xf32>
    %39 = vector.extract_strided_slice %36 {offsets = [0, 32], sizes = [2, 32], strides = [1, 1]} : vector<2x96xf32> to vector<2x32xf32>
    %40 = arith.mulf %39, %24 : vector<2x32xf32>
    %41 = vector.extract_strided_slice %36 {offsets = [0, 0], sizes = [2, 32], strides = [1, 1]} : vector<2x96xf32> to vector<2x32xf32>
    %42 = arith.mulf %41, %38 : vector<2x32xf32>
    %43 = arith.addf %40, %42 : vector<2x32xf32>
    %44 = vector.extract_strided_slice %36 {offsets = [0, 64], sizes = [2, 32], strides = [1, 1]} : vector<2x96xf32> to vector<2x32xf32>
    %45 = math.tanh %43 : vector<2x32xf32>
    %46 = arith.mulf %44, %45 : vector<2x32xf32>
    %47 = vector.extract_strided_slice %5 {offsets = [4, 0], sizes = [2, 128], strides = [1, 1]} : vector<16x128xf32> to vector<2x128xf32>
    %cst_13 = arith.constant dense<0.000000e+00> : vector<2x128xf32>
    %48 = tpu.matmul %46, %6, %cst_13 {dimension_numbers = #tpu.dot_dimension_numbers<[1], [0], [0], [1], [0, 0, 1, 1], [], []>} : vector<2x32xf32>, vector<32x128xf32>, vector<2x128xf32> -> vector<2x128xf32>
    %49 = arith.addf %47, %48 : vector<2x128xf32>
    %50 = vector.extract_strided_slice %49 {offsets = [0, 0], sizes = [2, 96], strides = [1, 1]} : vector<2x128xf32> to vector<2x96xf32>
    %51 = arith.negf %50 : vector<2x96xf32>
    %52 = math.exp %51 : vector<2x96xf32>
    %cst_14 = arith.constant 1.000000e+00 : f32
    %53 = vector.broadcast %cst_14 : f32 to vector<2x96xf32>
    %54 = arith.addf %53, %52 : vector<2x96xf32>
    %55 = arith.divf %53, %54 : vector<2x96xf32>
    %56 = vector.extract_strided_slice %49 {offsets = [0, 96], sizes = [2, 32], strides = [1, 1]} : vector<2x128xf32> to vector<2x32xf32>
    %57 = math.tanh %56 : vector<2x32xf32>
    %58 = vector.extract_strided_slice %55 {offsets = [0, 32], sizes = [2, 32], strides = [1, 1]} : vector<2x96xf32> to vector<2x32xf32>
    %59 = arith.mulf %58, %43 : vector<2x32xf32>
    %60 = vector.extract_strided_slice %55 {offsets = [0, 0], sizes = [2, 32], strides = [1, 1]} : vector<2x96xf32> to vector<2x32xf32>
    %61 = arith.mulf %60, %57 : vector<2x32xf32>
    %62 = arith.addf %59, %61 : vector<2x32xf32>
    %63 = vector.extract_strided_slice %55 {offsets = [0, 64], sizes = [2, 32], strides = [1, 1]} : vector<2x96xf32> to vector<2x32xf32>
    %64 = math.tanh %62 : vector<2x32xf32>
    %65 = arith.mulf %63, %64 : vector<2x32xf32>
    %66 = vector.extract_strided_slice %5 {offsets = [6, 0], sizes = [2, 128], strides = [1, 1]} : vector<16x128xf32> to vector<2x128xf32>
    %cst_15 = arith.constant dense<0.000000e+00> : vector<2x128xf32>
    %67 = tpu.matmul %65, %6, %cst_15 {dimension_numbers = #tpu.dot_dimension_numbers<[1], [0], [0], [1], [0, 0, 1, 1], [], []>} : vector<2x32xf32>, vector<32x128xf32>, vector<2x128xf32> -> vector<2x128xf32>
    %68 = arith.addf %66, %67 : vector<2x128xf32>
    %69 = vector.extract_strided_slice %68 {offsets = [0, 0], sizes = [2, 96], strides = [1, 1]} : vector<2x128xf32> to vector<2x96xf32>
    %70 = arith.negf %69 : vector<2x96xf32>
    %71 = math.exp %70 : vector<2x96xf32>
    %cst_16 = arith.constant 1.000000e+00 : f32
    %72 = vector.broadcast %cst_16 : f32 to vector<2x96xf32>
    %73 = arith.addf %72, %71 : vector<2x96xf32>
    %74 = arith.divf %72, %73 : vector<2x96xf32>
    %75 = vector.extract_strided_slice %68 {offsets = [0, 96], sizes = [2, 32], strides = [1, 1]} : vector<2x128xf32> to vector<2x32xf32>
    %76 = math.tanh %75 : vector<2x32xf32>
    %77 = vector.extract_strided_slice %74 {offsets = [0, 32], sizes = [2, 32], strides = [1, 1]} : vector<2x96xf32> to vector<2x32xf32>
    %78 = arith.mulf %77, %62 : vector<2x32xf32>
    %79 = vector.extract_strided_slice %74 {offsets = [0, 0], sizes = [2, 32], strides = [1, 1]} : vector<2x96xf32> to vector<2x32xf32>
    %80 = arith.mulf %79, %76 : vector<2x32xf32>
    %81 = arith.addf %78, %80 : vector<2x32xf32>
    %82 = vector.extract_strided_slice %74 {offsets = [0, 64], sizes = [2, 32], strides = [1, 1]} : vector<2x96xf32> to vector<2x32xf32>
    %83 = math.tanh %81 : vector<2x32xf32>
    %84 = arith.mulf %82, %83 : vector<2x32xf32>
    %85 = vector.extract_strided_slice %5 {offsets = [8, 0], sizes = [2, 128], strides = [1, 1]} : vector<16x128xf32> to vector<2x128xf32>
    %cst_17 = arith.constant dense<0.000000e+00> : vector<2x128xf32>
    %86 = tpu.matmul %84, %6, %cst_17 {dimension_numbers = #tpu.dot_dimension_numbers<[1], [0], [0], [1], [0, 0, 1, 1], [], []>} : vector<2x32xf32>, vector<32x128xf32>, vector<2x128xf32> -> vector<2x128xf32>
    %87 = arith.addf %85, %86 : vector<2x128xf32>
    %88 = vector.extract_strided_slice %87 {offsets = [0, 0], sizes = [2, 96], strides = [1, 1]} : vector<2x128xf32> to vector<2x96xf32>
    %89 = arith.negf %88 : vector<2x96xf32>
    %90 = math.exp %89 : vector<2x96xf32>
    %cst_18 = arith.constant 1.000000e+00 : f32
    %91 = vector.broadcast %cst_18 : f32 to vector<2x96xf32>
    %92 = arith.addf %91, %90 : vector<2x96xf32>
    %93 = arith.divf %91, %92 : vector<2x96xf32>
    %94 = vector.extract_strided_slice %87 {offsets = [0, 96], sizes = [2, 32], strides = [1, 1]} : vector<2x128xf32> to vector<2x32xf32>
    %95 = math.tanh %94 : vector<2x32xf32>
    %96 = vector.extract_strided_slice %93 {offsets = [0, 32], sizes = [2, 32], strides = [1, 1]} : vector<2x96xf32> to vector<2x32xf32>
    %97 = arith.mulf %96, %81 : vector<2x32xf32>
    %98 = vector.extract_strided_slice %93 {offsets = [0, 0], sizes = [2, 32], strides = [1, 1]} : vector<2x96xf32> to vector<2x32xf32>
    %99 = arith.mulf %98, %95 : vector<2x32xf32>
    %100 = arith.addf %97, %99 : vector<2x32xf32>
    %101 = vector.extract_strided_slice %93 {offsets = [0, 64], sizes = [2, 32], strides = [1, 1]} : vector<2x96xf32> to vector<2x32xf32>
    %102 = math.tanh %100 : vector<2x32xf32>
    %103 = arith.mulf %101, %102 : vector<2x32xf32>
    %104 = vector.extract_strided_slice %5 {offsets = [10, 0], sizes = [2, 128], strides = [1, 1]} : vector<16x128xf32> to vector<2x128xf32>
    %cst_19 = arith.constant dense<0.000000e+00> : vector<2x128xf32>
    %105 = tpu.matmul %103, %6, %cst_19 {dimension_numbers = #tpu.dot_dimension_numbers<[1], [0], [0], [1], [0, 0, 1, 1], [], []>} : vector<2x32xf32>, vector<32x128xf32>, vector<2x128xf32> -> vector<2x128xf32>
    %106 = arith.addf %104, %105 : vector<2x128xf32>
    %107 = vector.extract_strided_slice %106 {offsets = [0, 0], sizes = [2, 96], strides = [1, 1]} : vector<2x128xf32> to vector<2x96xf32>
    %108 = arith.negf %107 : vector<2x96xf32>
    %109 = math.exp %108 : vector<2x96xf32>
    %cst_20 = arith.constant 1.000000e+00 : f32
    %110 = vector.broadcast %cst_20 : f32 to vector<2x96xf32>
    %111 = arith.addf %110, %109 : vector<2x96xf32>
    %112 = arith.divf %110, %111 : vector<2x96xf32>
    %113 = vector.extract_strided_slice %106 {offsets = [0, 96], sizes = [2, 32], strides = [1, 1]} : vector<2x128xf32> to vector<2x32xf32>
    %114 = math.tanh %113 : vector<2x32xf32>
    %115 = vector.extract_strided_slice %112 {offsets = [0, 32], sizes = [2, 32], strides = [1, 1]} : vector<2x96xf32> to vector<2x32xf32>
    %116 = arith.mulf %115, %100 : vector<2x32xf32>
    %117 = vector.extract_strided_slice %112 {offsets = [0, 0], sizes = [2, 32], strides = [1, 1]} : vector<2x96xf32> to vector<2x32xf32>
    %118 = arith.mulf %117, %114 : vector<2x32xf32>
    %119 = arith.addf %116, %118 : vector<2x32xf32>
    %120 = vector.extract_strided_slice %112 {offsets = [0, 64], sizes = [2, 32], strides = [1, 1]} : vector<2x96xf32> to vector<2x32xf32>
    %121 = math.tanh %119 : vector<2x32xf32>
    %122 = arith.mulf %120, %121 : vector<2x32xf32>
    %123 = vector.extract_strided_slice %5 {offsets = [12, 0], sizes = [2, 128], strides = [1, 1]} : vector<16x128xf32> to vector<2x128xf32>
    %cst_21 = arith.constant dense<0.000000e+00> : vector<2x128xf32>
    %124 = tpu.matmul %122, %6, %cst_21 {dimension_numbers = #tpu.dot_dimension_numbers<[1], [0], [0], [1], [0, 0, 1, 1], [], []>} : vector<2x32xf32>, vector<32x128xf32>, vector<2x128xf32> -> vector<2x128xf32>
    %125 = arith.addf %123, %124 : vector<2x128xf32>
    %126 = vector.extract_strided_slice %125 {offsets = [0, 0], sizes = [2, 96], strides = [1, 1]} : vector<2x128xf32> to vector<2x96xf32>
    %127 = arith.negf %126 : vector<2x96xf32>
    %128 = math.exp %127 : vector<2x96xf32>
    %cst_22 = arith.constant 1.000000e+00 : f32
    %129 = vector.broadcast %cst_22 : f32 to vector<2x96xf32>
    %130 = arith.addf %129, %128 : vector<2x96xf32>
    %131 = arith.divf %129, %130 : vector<2x96xf32>
    %132 = vector.extract_strided_slice %125 {offsets = [0, 96], sizes = [2, 32], strides = [1, 1]} : vector<2x128xf32> to vector<2x32xf32>
    %133 = math.tanh %132 : vector<2x32xf32>
    %134 = vector.extract_strided_slice %131 {offsets = [0, 32], sizes = [2, 32], strides = [1, 1]} : vector<2x96xf32> to vector<2x32xf32>
    %135 = arith.mulf %134, %119 : vector<2x32xf32>
    %136 = vector.extract_strided_slice %131 {offsets = [0, 0], sizes = [2, 32], strides = [1, 1]} : vector<2x96xf32> to vector<2x32xf32>
    %137 = arith.mulf %136, %133 : vector<2x32xf32>
    %138 = arith.addf %135, %137 : vector<2x32xf32>
    %139 = vector.extract_strided_slice %131 {offsets = [0, 64], sizes = [2, 32], strides = [1, 1]} : vector<2x96xf32> to vector<2x32xf32>
    %140 = math.tanh %138 : vector<2x32xf32>
    %141 = arith.mulf %139, %140 : vector<2x32xf32>
    %142 = vector.extract_strided_slice %5 {offsets = [14, 0], sizes = [2, 128], strides = [1, 1]} : vector<16x128xf32> to vector<2x128xf32>
    %cst_23 = arith.constant dense<0.000000e+00> : vector<2x128xf32>
    %143 = tpu.matmul %141, %6, %cst_23 {dimension_numbers = #tpu.dot_dimension_numbers<[1], [0], [0], [1], [0, 0, 1, 1], [], []>} : vector<2x32xf32>, vector<32x128xf32>, vector<2x128xf32> -> vector<2x128xf32>
    %144 = arith.addf %142, %143 : vector<2x128xf32>
    %145 = vector.extract_strided_slice %144 {offsets = [0, 0], sizes = [2, 96], strides = [1, 1]} : vector<2x128xf32> to vector<2x96xf32>
    %146 = arith.negf %145 : vector<2x96xf32>
    %147 = math.exp %146 : vector<2x96xf32>
    %cst_24 = arith.constant 1.000000e+00 : f32
    %148 = vector.broadcast %cst_24 : f32 to vector<2x96xf32>
    %149 = arith.addf %148, %147 : vector<2x96xf32>
    %150 = arith.divf %148, %149 : vector<2x96xf32>
    %151 = vector.extract_strided_slice %144 {offsets = [0, 96], sizes = [2, 32], strides = [1, 1]} : vector<2x128xf32> to vector<2x32xf32>
    %152 = math.tanh %151 : vector<2x32xf32>
    %153 = vector.extract_strided_slice %150 {offsets = [0, 32], sizes = [2, 32], strides = [1, 1]} : vector<2x96xf32> to vector<2x32xf32>
    %154 = arith.mulf %153, %138 : vector<2x32xf32>
    %155 = vector.extract_strided_slice %150 {offsets = [0, 0], sizes = [2, 32], strides = [1, 1]} : vector<2x96xf32> to vector<2x32xf32>
    %156 = arith.mulf %155, %152 : vector<2x32xf32>
    %157 = arith.addf %154, %156 : vector<2x32xf32>
    %158 = vector.extract_strided_slice %150 {offsets = [0, 64], sizes = [2, 32], strides = [1, 1]} : vector<2x96xf32> to vector<2x32xf32>
    %159 = math.tanh %157 : vector<2x32xf32>
    %160 = arith.mulf %158, %159 : vector<2x32xf32>
    %c0_25 = arith.constant 0 : index
    %c0_26 = arith.constant 0 : index
    %161 = vector.load %arg5[%c0_25, %c0_26] : memref<32x128xf32, #tpu.memory_space<vmem>>, vector<32x128xf32>
    %c0_27 = arith.constant 0 : index
    %c0_28 = arith.constant 0 : index
    %162 = vector.load %arg4[%c0_27, %c0_28] : memref<32x128xf32, #tpu.memory_space<vmem>>, vector<32x128xf32>
    %c0_29 = arith.constant 0 : index
    %c0_30 = arith.constant 0 : index
    %163 = vector.load %arg6[%c0_29, %c0_30] : memref<1x128xf32, #tpu.memory_space<vmem>>, vector<1x128xf32>
    %cst_31 = arith.constant 0.000000e+00 : f32
    %164 = vector.broadcast %cst_31 : f32 to vector<2x32xf32>
    %cst_32 = arith.constant 0.000000e+00 : f32
    %165 = vector.broadcast %cst_32 : f32 to vector<2x32xf32>
    %cst_33 = arith.constant dense<0.000000e+00> : vector<2x128xf32>
    %166 = tpu.matmul %27, %162, %cst_33 {dimension_numbers = #tpu.dot_dimension_numbers<[1], [0], [0], [1], [0, 0, 1, 1], [], []>} : vector<2x32xf32>, vector<32x128xf32>, vector<2x128xf32> -> vector<2x128xf32>
    %167 = vector.broadcast %163 : vector<1x128xf32> to vector<2x128xf32>
    %168 = arith.addf %166, %167 : vector<2x128xf32>
    %cst_34 = arith.constant dense<0.000000e+00> : vector<2x128xf32>
    %169 = tpu.matmul %164, %161, %cst_34 {dimension_numbers = #tpu.dot_dimension_numbers<[1], [0], [0], [1], [0, 0, 1, 1], [], []>} : vector<2x32xf32>, vector<32x128xf32>, vector<2x128xf32> -> vector<2x128xf32>
    %170 = arith.addf %168, %169 : vector<2x128xf32>
    %171 = vector.extract_strided_slice %170 {offsets = [0, 0], sizes = [2, 96], strides = [1, 1]} : vector<2x128xf32> to vector<2x96xf32>
    %172 = arith.negf %171 : vector<2x96xf32>
    %173 = math.exp %172 : vector<2x96xf32>
    %cst_35 = arith.constant 1.000000e+00 : f32
    %174 = vector.broadcast %cst_35 : f32 to vector<2x96xf32>
    %175 = arith.addf %174, %173 : vector<2x96xf32>
    %176 = arith.divf %174, %175 : vector<2x96xf32>
    %177 = vector.extract_strided_slice %170 {offsets = [0, 96], sizes = [2, 32], strides = [1, 1]} : vector<2x128xf32> to vector<2x32xf32>
    %178 = math.tanh %177 : vector<2x32xf32>
    %179 = vector.extract_strided_slice %176 {offsets = [0, 32], sizes = [2, 32], strides = [1, 1]} : vector<2x96xf32> to vector<2x32xf32>
    %180 = arith.mulf %179, %165 : vector<2x32xf32>
    %181 = vector.extract_strided_slice %176 {offsets = [0, 0], sizes = [2, 32], strides = [1, 1]} : vector<2x96xf32> to vector<2x32xf32>
    %182 = arith.mulf %181, %178 : vector<2x32xf32>
    %183 = arith.addf %180, %182 : vector<2x32xf32>
    %184 = vector.extract_strided_slice %176 {offsets = [0, 64], sizes = [2, 32], strides = [1, 1]} : vector<2x96xf32> to vector<2x32xf32>
    %185 = math.tanh %183 : vector<2x32xf32>
    %186 = arith.mulf %184, %185 : vector<2x32xf32>
    %cst_36 = arith.constant dense<0.000000e+00> : vector<2x128xf32>
    %187 = tpu.matmul %46, %162, %cst_36 {dimension_numbers = #tpu.dot_dimension_numbers<[1], [0], [0], [1], [0, 0, 1, 1], [], []>} : vector<2x32xf32>, vector<32x128xf32>, vector<2x128xf32> -> vector<2x128xf32>
    %188 = vector.broadcast %163 : vector<1x128xf32> to vector<2x128xf32>
    %189 = arith.addf %187, %188 : vector<2x128xf32>
    %cst_37 = arith.constant dense<0.000000e+00> : vector<2x128xf32>
    %190 = tpu.matmul %186, %161, %cst_37 {dimension_numbers = #tpu.dot_dimension_numbers<[1], [0], [0], [1], [0, 0, 1, 1], [], []>} : vector<2x32xf32>, vector<32x128xf32>, vector<2x128xf32> -> vector<2x128xf32>
    %191 = arith.addf %189, %190 : vector<2x128xf32>
    %192 = vector.extract_strided_slice %191 {offsets = [0, 0], sizes = [2, 96], strides = [1, 1]} : vector<2x128xf32> to vector<2x96xf32>
    %193 = arith.negf %192 : vector<2x96xf32>
    %194 = math.exp %193 : vector<2x96xf32>
    %cst_38 = arith.constant 1.000000e+00 : f32
    %195 = vector.broadcast %cst_38 : f32 to vector<2x96xf32>
    %196 = arith.addf %195, %194 : vector<2x96xf32>
    %197 = arith.divf %195, %196 : vector<2x96xf32>
    %198 = vector.extract_strided_slice %191 {offsets = [0, 96], sizes = [2, 32], strides = [1, 1]} : vector<2x128xf32> to vector<2x32xf32>
    %199 = math.tanh %198 : vector<2x32xf32>
    %200 = vector.extract_strided_slice %197 {offsets = [0, 32], sizes = [2, 32], strides = [1, 1]} : vector<2x96xf32> to vector<2x32xf32>
    %201 = arith.mulf %200, %183 : vector<2x32xf32>
    %202 = vector.extract_strided_slice %197 {offsets = [0, 0], sizes = [2, 32], strides = [1, 1]} : vector<2x96xf32> to vector<2x32xf32>
    %203 = arith.mulf %202, %199 : vector<2x32xf32>
    %204 = arith.addf %201, %203 : vector<2x32xf32>
    %205 = vector.extract_strided_slice %197 {offsets = [0, 64], sizes = [2, 32], strides = [1, 1]} : vector<2x96xf32> to vector<2x32xf32>
    %206 = math.tanh %204 : vector<2x32xf32>
    %207 = arith.mulf %205, %206 : vector<2x32xf32>
    %cst_39 = arith.constant dense<0.000000e+00> : vector<2x128xf32>
    %208 = tpu.matmul %65, %162, %cst_39 {dimension_numbers = #tpu.dot_dimension_numbers<[1], [0], [0], [1], [0, 0, 1, 1], [], []>} : vector<2x32xf32>, vector<32x128xf32>, vector<2x128xf32> -> vector<2x128xf32>
    %209 = vector.broadcast %163 : vector<1x128xf32> to vector<2x128xf32>
    %210 = arith.addf %208, %209 : vector<2x128xf32>
    %cst_40 = arith.constant dense<0.000000e+00> : vector<2x128xf32>
    %211 = tpu.matmul %207, %161, %cst_40 {dimension_numbers = #tpu.dot_dimension_numbers<[1], [0], [0], [1], [0, 0, 1, 1], [], []>} : vector<2x32xf32>, vector<32x128xf32>, vector<2x128xf32> -> vector<2x128xf32>
    %212 = arith.addf %210, %211 : vector<2x128xf32>
    %213 = vector.extract_strided_slice %212 {offsets = [0, 0], sizes = [2, 96], strides = [1, 1]} : vector<2x128xf32> to vector<2x96xf32>
    %214 = arith.negf %213 : vector<2x96xf32>
    %215 = math.exp %214 : vector<2x96xf32>
    %cst_41 = arith.constant 1.000000e+00 : f32
    %216 = vector.broadcast %cst_41 : f32 to vector<2x96xf32>
    %217 = arith.addf %216, %215 : vector<2x96xf32>
    %218 = arith.divf %216, %217 : vector<2x96xf32>
    %219 = vector.extract_strided_slice %212 {offsets = [0, 96], sizes = [2, 32], strides = [1, 1]} : vector<2x128xf32> to vector<2x32xf32>
    %220 = math.tanh %219 : vector<2x32xf32>
    %221 = vector.extract_strided_slice %218 {offsets = [0, 32], sizes = [2, 32], strides = [1, 1]} : vector<2x96xf32> to vector<2x32xf32>
    %222 = arith.mulf %221, %204 : vector<2x32xf32>
    %223 = vector.extract_strided_slice %218 {offsets = [0, 0], sizes = [2, 32], strides = [1, 1]} : vector<2x96xf32> to vector<2x32xf32>
    %224 = arith.mulf %223, %220 : vector<2x32xf32>
    %225 = arith.addf %222, %224 : vector<2x32xf32>
    %226 = vector.extract_strided_slice %218 {offsets = [0, 64], sizes = [2, 32], strides = [1, 1]} : vector<2x96xf32> to vector<2x32xf32>
    %227 = math.tanh %225 : vector<2x32xf32>
    %228 = arith.mulf %226, %227 : vector<2x32xf32>
    %cst_42 = arith.constant dense<0.000000e+00> : vector<2x128xf32>
    %229 = tpu.matmul %84, %162, %cst_42 {dimension_numbers = #tpu.dot_dimension_numbers<[1], [0], [0], [1], [0, 0, 1, 1], [], []>} : vector<2x32xf32>, vector<32x128xf32>, vector<2x128xf32> -> vector<2x128xf32>
    %230 = vector.broadcast %163 : vector<1x128xf32> to vector<2x128xf32>
    %231 = arith.addf %229, %230 : vector<2x128xf32>
    %cst_43 = arith.constant dense<0.000000e+00> : vector<2x128xf32>
    %232 = tpu.matmul %228, %161, %cst_43 {dimension_numbers = #tpu.dot_dimension_numbers<[1], [0], [0], [1], [0, 0, 1, 1], [], []>} : vector<2x32xf32>, vector<32x128xf32>, vector<2x128xf32> -> vector<2x128xf32>
    %233 = arith.addf %231, %232 : vector<2x128xf32>
    %234 = vector.extract_strided_slice %233 {offsets = [0, 0], sizes = [2, 96], strides = [1, 1]} : vector<2x128xf32> to vector<2x96xf32>
    %235 = arith.negf %234 : vector<2x96xf32>
    %236 = math.exp %235 : vector<2x96xf32>
    %cst_44 = arith.constant 1.000000e+00 : f32
    %237 = vector.broadcast %cst_44 : f32 to vector<2x96xf32>
    %238 = arith.addf %237, %236 : vector<2x96xf32>
    %239 = arith.divf %237, %238 : vector<2x96xf32>
    %240 = vector.extract_strided_slice %233 {offsets = [0, 96], sizes = [2, 32], strides = [1, 1]} : vector<2x128xf32> to vector<2x32xf32>
    %241 = math.tanh %240 : vector<2x32xf32>
    %242 = vector.extract_strided_slice %239 {offsets = [0, 32], sizes = [2, 32], strides = [1, 1]} : vector<2x96xf32> to vector<2x32xf32>
    %243 = arith.mulf %242, %225 : vector<2x32xf32>
    %244 = vector.extract_strided_slice %239 {offsets = [0, 0], sizes = [2, 32], strides = [1, 1]} : vector<2x96xf32> to vector<2x32xf32>
    %245 = arith.mulf %244, %241 : vector<2x32xf32>
    %246 = arith.addf %243, %245 : vector<2x32xf32>
    %247 = vector.extract_strided_slice %239 {offsets = [0, 64], sizes = [2, 32], strides = [1, 1]} : vector<2x96xf32> to vector<2x32xf32>
    %248 = math.tanh %246 : vector<2x32xf32>
    %249 = arith.mulf %247, %248 : vector<2x32xf32>
    %cst_45 = arith.constant dense<0.000000e+00> : vector<2x128xf32>
    %250 = tpu.matmul %103, %162, %cst_45 {dimension_numbers = #tpu.dot_dimension_numbers<[1], [0], [0], [1], [0, 0, 1, 1], [], []>} : vector<2x32xf32>, vector<32x128xf32>, vector<2x128xf32> -> vector<2x128xf32>
    %251 = vector.broadcast %163 : vector<1x128xf32> to vector<2x128xf32>
    %252 = arith.addf %250, %251 : vector<2x128xf32>
    %cst_46 = arith.constant dense<0.000000e+00> : vector<2x128xf32>
    %253 = tpu.matmul %249, %161, %cst_46 {dimension_numbers = #tpu.dot_dimension_numbers<[1], [0], [0], [1], [0, 0, 1, 1], [], []>} : vector<2x32xf32>, vector<32x128xf32>, vector<2x128xf32> -> vector<2x128xf32>
    %254 = arith.addf %252, %253 : vector<2x128xf32>
    %255 = vector.extract_strided_slice %254 {offsets = [0, 0], sizes = [2, 96], strides = [1, 1]} : vector<2x128xf32> to vector<2x96xf32>
    %256 = arith.negf %255 : vector<2x96xf32>
    %257 = math.exp %256 : vector<2x96xf32>
    %cst_47 = arith.constant 1.000000e+00 : f32
    %258 = vector.broadcast %cst_47 : f32 to vector<2x96xf32>
    %259 = arith.addf %258, %257 : vector<2x96xf32>
    %260 = arith.divf %258, %259 : vector<2x96xf32>
    %261 = vector.extract_strided_slice %254 {offsets = [0, 96], sizes = [2, 32], strides = [1, 1]} : vector<2x128xf32> to vector<2x32xf32>
    %262 = math.tanh %261 : vector<2x32xf32>
    %263 = vector.extract_strided_slice %260 {offsets = [0, 32], sizes = [2, 32], strides = [1, 1]} : vector<2x96xf32> to vector<2x32xf32>
    %264 = arith.mulf %263, %246 : vector<2x32xf32>
    %265 = vector.extract_strided_slice %260 {offsets = [0, 0], sizes = [2, 32], strides = [1, 1]} : vector<2x96xf32> to vector<2x32xf32>
    %266 = arith.mulf %265, %262 : vector<2x32xf32>
    %267 = arith.addf %264, %266 : vector<2x32xf32>
    %268 = vector.extract_strided_slice %260 {offsets = [0, 64], sizes = [2, 32], strides = [1, 1]} : vector<2x96xf32> to vector<2x32xf32>
    %269 = math.tanh %267 : vector<2x32xf32>
    %270 = arith.mulf %268, %269 : vector<2x32xf32>
    %cst_48 = arith.constant dense<0.000000e+00> : vector<2x128xf32>
    %271 = tpu.matmul %122, %162, %cst_48 {dimension_numbers = #tpu.dot_dimension_numbers<[1], [0], [0], [1], [0, 0, 1, 1], [], []>} : vector<2x32xf32>, vector<32x128xf32>, vector<2x128xf32> -> vector<2x128xf32>
    %272 = vector.broadcast %163 : vector<1x128xf32> to vector<2x128xf32>
    %273 = arith.addf %271, %272 : vector<2x128xf32>
    %cst_49 = arith.constant dense<0.000000e+00> : vector<2x128xf32>
    %274 = tpu.matmul %270, %161, %cst_49 {dimension_numbers = #tpu.dot_dimension_numbers<[1], [0], [0], [1], [0, 0, 1, 1], [], []>} : vector<2x32xf32>, vector<32x128xf32>, vector<2x128xf32> -> vector<2x128xf32>
    %275 = arith.addf %273, %274 : vector<2x128xf32>
    %276 = vector.extract_strided_slice %275 {offsets = [0, 0], sizes = [2, 96], strides = [1, 1]} : vector<2x128xf32> to vector<2x96xf32>
    %277 = arith.negf %276 : vector<2x96xf32>
    %278 = math.exp %277 : vector<2x96xf32>
    %cst_50 = arith.constant 1.000000e+00 : f32
    %279 = vector.broadcast %cst_50 : f32 to vector<2x96xf32>
    %280 = arith.addf %279, %278 : vector<2x96xf32>
    %281 = arith.divf %279, %280 : vector<2x96xf32>
    %282 = vector.extract_strided_slice %275 {offsets = [0, 96], sizes = [2, 32], strides = [1, 1]} : vector<2x128xf32> to vector<2x32xf32>
    %283 = math.tanh %282 : vector<2x32xf32>
    %284 = vector.extract_strided_slice %281 {offsets = [0, 32], sizes = [2, 32], strides = [1, 1]} : vector<2x96xf32> to vector<2x32xf32>
    %285 = arith.mulf %284, %267 : vector<2x32xf32>
    %286 = vector.extract_strided_slice %281 {offsets = [0, 0], sizes = [2, 32], strides = [1, 1]} : vector<2x96xf32> to vector<2x32xf32>
    %287 = arith.mulf %286, %283 : vector<2x32xf32>
    %288 = arith.addf %285, %287 : vector<2x32xf32>
    %289 = vector.extract_strided_slice %281 {offsets = [0, 64], sizes = [2, 32], strides = [1, 1]} : vector<2x96xf32> to vector<2x32xf32>
    %290 = math.tanh %288 : vector<2x32xf32>
    %291 = arith.mulf %289, %290 : vector<2x32xf32>
    %cst_51 = arith.constant dense<0.000000e+00> : vector<2x128xf32>
    %292 = tpu.matmul %141, %162, %cst_51 {dimension_numbers = #tpu.dot_dimension_numbers<[1], [0], [0], [1], [0, 0, 1, 1], [], []>} : vector<2x32xf32>, vector<32x128xf32>, vector<2x128xf32> -> vector<2x128xf32>
    %293 = vector.broadcast %163 : vector<1x128xf32> to vector<2x128xf32>
    %294 = arith.addf %292, %293 : vector<2x128xf32>
    %cst_52 = arith.constant dense<0.000000e+00> : vector<2x128xf32>
    %295 = tpu.matmul %291, %161, %cst_52 {dimension_numbers = #tpu.dot_dimension_numbers<[1], [0], [0], [1], [0, 0, 1, 1], [], []>} : vector<2x32xf32>, vector<32x128xf32>, vector<2x128xf32> -> vector<2x128xf32>
    %296 = arith.addf %294, %295 : vector<2x128xf32>
    %297 = vector.extract_strided_slice %296 {offsets = [0, 0], sizes = [2, 96], strides = [1, 1]} : vector<2x128xf32> to vector<2x96xf32>
    %298 = arith.negf %297 : vector<2x96xf32>
    %299 = math.exp %298 : vector<2x96xf32>
    %cst_53 = arith.constant 1.000000e+00 : f32
    %300 = vector.broadcast %cst_53 : f32 to vector<2x96xf32>
    %301 = arith.addf %300, %299 : vector<2x96xf32>
    %302 = arith.divf %300, %301 : vector<2x96xf32>
    %303 = vector.extract_strided_slice %296 {offsets = [0, 96], sizes = [2, 32], strides = [1, 1]} : vector<2x128xf32> to vector<2x32xf32>
    %304 = math.tanh %303 : vector<2x32xf32>
    %305 = vector.extract_strided_slice %302 {offsets = [0, 32], sizes = [2, 32], strides = [1, 1]} : vector<2x96xf32> to vector<2x32xf32>
    %306 = arith.mulf %305, %288 : vector<2x32xf32>
    %307 = vector.extract_strided_slice %302 {offsets = [0, 0], sizes = [2, 32], strides = [1, 1]} : vector<2x96xf32> to vector<2x32xf32>
    %308 = arith.mulf %307, %304 : vector<2x32xf32>
    %309 = arith.addf %306, %308 : vector<2x32xf32>
    %310 = vector.extract_strided_slice %302 {offsets = [0, 64], sizes = [2, 32], strides = [1, 1]} : vector<2x96xf32> to vector<2x32xf32>
    %311 = math.tanh %309 : vector<2x32xf32>
    %312 = arith.mulf %310, %311 : vector<2x32xf32>
    %cst_54 = arith.constant dense<0.000000e+00> : vector<2x128xf32>
    %313 = tpu.matmul %160, %162, %cst_54 {dimension_numbers = #tpu.dot_dimension_numbers<[1], [0], [0], [1], [0, 0, 1, 1], [], []>} : vector<2x32xf32>, vector<32x128xf32>, vector<2x128xf32> -> vector<2x128xf32>
    %314 = vector.broadcast %163 : vector<1x128xf32> to vector<2x128xf32>
    %315 = arith.addf %313, %314 : vector<2x128xf32>
    %cst_55 = arith.constant dense<0.000000e+00> : vector<2x128xf32>
    %316 = tpu.matmul %312, %161, %cst_55 {dimension_numbers = #tpu.dot_dimension_numbers<[1], [0], [0], [1], [0, 0, 1, 1], [], []>} : vector<2x32xf32>, vector<32x128xf32>, vector<2x128xf32> -> vector<2x128xf32>
    %317 = arith.addf %315, %316 : vector<2x128xf32>
    %318 = vector.extract_strided_slice %317 {offsets = [0, 0], sizes = [2, 96], strides = [1, 1]} : vector<2x128xf32> to vector<2x96xf32>
    %319 = arith.negf %318 : vector<2x96xf32>
    %320 = math.exp %319 : vector<2x96xf32>
    %cst_56 = arith.constant 1.000000e+00 : f32
    %321 = vector.broadcast %cst_56 : f32 to vector<2x96xf32>
    %322 = arith.addf %321, %320 : vector<2x96xf32>
    %323 = arith.divf %321, %322 : vector<2x96xf32>
    %324 = vector.extract_strided_slice %317 {offsets = [0, 96], sizes = [2, 32], strides = [1, 1]} : vector<2x128xf32> to vector<2x32xf32>
    %325 = math.tanh %324 : vector<2x32xf32>
    %326 = vector.extract_strided_slice %323 {offsets = [0, 32], sizes = [2, 32], strides = [1, 1]} : vector<2x96xf32> to vector<2x32xf32>
    %327 = arith.mulf %326, %309 : vector<2x32xf32>
    %328 = vector.extract_strided_slice %323 {offsets = [0, 0], sizes = [2, 32], strides = [1, 1]} : vector<2x96xf32> to vector<2x32xf32>
    %329 = arith.mulf %328, %325 : vector<2x32xf32>
    %330 = arith.addf %327, %329 : vector<2x32xf32>
    %331 = vector.extract_strided_slice %323 {offsets = [0, 64], sizes = [2, 32], strides = [1, 1]} : vector<2x96xf32> to vector<2x32xf32>
    %332 = math.tanh %330 : vector<2x32xf32>
    %333 = arith.mulf %331, %332 : vector<2x32xf32>
    %cst_57 = arith.constant 0.000000e+00 : f32
    %334 = vector.broadcast %cst_57 : f32 to vector<2x128xf32>
    %c0_58 = arith.constant 0 : index
    %c0_59 = arith.constant 0 : index
    %335 = vector.load %arg7[%c0_58, %c0_59] : memref<256x128xf32, #tpu.memory_space<vmem>>, vector<32x128xf32>
    %cst_60 = arith.constant dense<0.000000e+00> : vector<2x128xf32>
    %336 = tpu.matmul %186, %335, %cst_60 {dimension_numbers = #tpu.dot_dimension_numbers<[1], [0], [0], [1], [0, 0, 1, 1], [], []>} : vector<2x32xf32>, vector<32x128xf32>, vector<2x128xf32> -> vector<2x128xf32>
    %337 = arith.addf %334, %336 : vector<2x128xf32>
    %c32 = arith.constant 32 : index
    %c0_61 = arith.constant 0 : index
    %338 = vector.load %arg7[%c32, %c0_61] : memref<256x128xf32, #tpu.memory_space<vmem>>, vector<32x128xf32>
    %cst_62 = arith.constant dense<0.000000e+00> : vector<2x128xf32>
    %339 = tpu.matmul %207, %338, %cst_62 {dimension_numbers = #tpu.dot_dimension_numbers<[1], [0], [0], [1], [0, 0, 1, 1], [], []>} : vector<2x32xf32>, vector<32x128xf32>, vector<2x128xf32> -> vector<2x128xf32>
    %340 = arith.addf %337, %339 : vector<2x128xf32>
    %c64 = arith.constant 64 : index
    %c0_63 = arith.constant 0 : index
    %341 = vector.load %arg7[%c64, %c0_63] : memref<256x128xf32, #tpu.memory_space<vmem>>, vector<32x128xf32>
    %cst_64 = arith.constant dense<0.000000e+00> : vector<2x128xf32>
    %342 = tpu.matmul %228, %341, %cst_64 {dimension_numbers = #tpu.dot_dimension_numbers<[1], [0], [0], [1], [0, 0, 1, 1], [], []>} : vector<2x32xf32>, vector<32x128xf32>, vector<2x128xf32> -> vector<2x128xf32>
    %343 = arith.addf %340, %342 : vector<2x128xf32>
    %c96 = arith.constant 96 : index
    %c0_65 = arith.constant 0 : index
    %344 = vector.load %arg7[%c96, %c0_65] : memref<256x128xf32, #tpu.memory_space<vmem>>, vector<32x128xf32>
    %cst_66 = arith.constant dense<0.000000e+00> : vector<2x128xf32>
    %345 = tpu.matmul %249, %344, %cst_66 {dimension_numbers = #tpu.dot_dimension_numbers<[1], [0], [0], [1], [0, 0, 1, 1], [], []>} : vector<2x32xf32>, vector<32x128xf32>, vector<2x128xf32> -> vector<2x128xf32>
    %346 = arith.addf %343, %345 : vector<2x128xf32>
    %c128 = arith.constant 128 : index
    %c0_67 = arith.constant 0 : index
    %347 = vector.load %arg7[%c128, %c0_67] : memref<256x128xf32, #tpu.memory_space<vmem>>, vector<32x128xf32>
    %cst_68 = arith.constant dense<0.000000e+00> : vector<2x128xf32>
    %348 = tpu.matmul %270, %347, %cst_68 {dimension_numbers = #tpu.dot_dimension_numbers<[1], [0], [0], [1], [0, 0, 1, 1], [], []>} : vector<2x32xf32>, vector<32x128xf32>, vector<2x128xf32> -> vector<2x128xf32>
    %349 = arith.addf %346, %348 : vector<2x128xf32>
    %c160 = arith.constant 160 : index
    %c0_69 = arith.constant 0 : index
    %350 = vector.load %arg7[%c160, %c0_69] : memref<256x128xf32, #tpu.memory_space<vmem>>, vector<32x128xf32>
    %cst_70 = arith.constant dense<0.000000e+00> : vector<2x128xf32>
    %351 = tpu.matmul %291, %350, %cst_70 {dimension_numbers = #tpu.dot_dimension_numbers<[1], [0], [0], [1], [0, 0, 1, 1], [], []>} : vector<2x32xf32>, vector<32x128xf32>, vector<2x128xf32> -> vector<2x128xf32>
    %352 = arith.addf %349, %351 : vector<2x128xf32>
    %c192 = arith.constant 192 : index
    %c0_71 = arith.constant 0 : index
    %353 = vector.load %arg7[%c192, %c0_71] : memref<256x128xf32, #tpu.memory_space<vmem>>, vector<32x128xf32>
    %cst_72 = arith.constant dense<0.000000e+00> : vector<2x128xf32>
    %354 = tpu.matmul %312, %353, %cst_72 {dimension_numbers = #tpu.dot_dimension_numbers<[1], [0], [0], [1], [0, 0, 1, 1], [], []>} : vector<2x32xf32>, vector<32x128xf32>, vector<2x128xf32> -> vector<2x128xf32>
    %355 = arith.addf %352, %354 : vector<2x128xf32>
    %c224 = arith.constant 224 : index
    %c0_73 = arith.constant 0 : index
    %356 = vector.load %arg7[%c224, %c0_73] : memref<256x128xf32, #tpu.memory_space<vmem>>, vector<32x128xf32>
    %cst_74 = arith.constant dense<0.000000e+00> : vector<2x128xf32>
    %357 = tpu.matmul %333, %356, %cst_74 {dimension_numbers = #tpu.dot_dimension_numbers<[1], [0], [0], [1], [0, 0, 1, 1], [], []>} : vector<2x32xf32>, vector<32x128xf32>, vector<2x128xf32> -> vector<2x128xf32>
    %358 = arith.addf %355, %357 : vector<2x128xf32>
    %c0_75 = arith.constant 0 : index
    %c0_76 = arith.constant 0 : index
    %359 = vector.load %arg8[%c0_75, %c0_76] : memref<1x128xf32, #tpu.memory_space<vmem>>, vector<1x128xf32>
    %360 = vector.broadcast %359 : vector<1x128xf32> to vector<2x128xf32>
    %361 = arith.addf %358, %360 : vector<2x128xf32>
    %cst_77 = arith.constant 0.000000e+00 : f32
    %362 = vector.broadcast %cst_77 : f32 to vector<2x128xf32>
    %363 = arith.maximumf %361, %362 : vector<2x128xf32>
    %c0_78 = arith.constant 0 : index
    %c0_79 = arith.constant 0 : index
    %364 = vector.load %arg9[%c0_78, %c0_79] : memref<128x64xf32, #tpu.memory_space<vmem>>, vector<128x64xf32>
    %cst_80 = arith.constant dense<0.000000e+00> : vector<2x64xf32>
    %365 = tpu.matmul %363, %364, %cst_80 {dimension_numbers = #tpu.dot_dimension_numbers<[1], [0], [0], [1], [0, 0, 1, 1], [], []>} : vector<2x128xf32>, vector<128x64xf32>, vector<2x64xf32> -> vector<2x64xf32>
    %c0_81 = arith.constant 0 : index
    %c0_82 = arith.constant 0 : index
    %366 = vector.load %arg10[%c0_81, %c0_82] : memref<1x64xf32, #tpu.memory_space<vmem>>, vector<1x64xf32>
    %367 = vector.broadcast %366 : vector<1x64xf32> to vector<2x64xf32>
    %368 = arith.addf %365, %367 : vector<2x64xf32>
    %cst_83 = arith.constant 0.000000e+00 : f32
    %369 = vector.broadcast %cst_83 : f32 to vector<2x64xf32>
    %370 = arith.maximumf %368, %369 : vector<2x64xf32>
    %c0_84 = arith.constant 0 : index
    %c0_85 = arith.constant 0 : index
    %371 = vector.load %arg11[%c0_84, %c0_85] : memref<1x64xf32, #tpu.memory_space<vmem>>, vector<1x64xf32>
    %372 = vector.broadcast %371 : vector<1x64xf32> to vector<2x64xf32>
    %373 = arith.mulf %370, %372 : vector<2x64xf32>
    %cst_86 = arith.constant dense<0.000000e+00> : vector<2xf32>
    %374 = vector.multi_reduction <add>, %373, %cst_86 [1] : vector<2x64xf32> to vector<2xf32>
    %375 = vector.shape_cast %374 : vector<2xf32> to vector<2x1xf32>
    %c0_87 = arith.constant 0 : index
    %c0_88 = arith.constant 0 : index
    %376 = vector.load %arg12[%c0_87, %c0_88] : memref<1x1xf32, #tpu.memory_space<vmem>>, vector<1x1xf32>
    %377 = vector.broadcast %376 : vector<1x1xf32> to vector<2x1xf32>
    %378 = arith.addf %375, %377 : vector<2x1xf32>
    %379 = arith.negf %378 : vector<2x1xf32>
    %380 = math.exp %379 : vector<2x1xf32>
    %cst_89 = arith.constant 1.000000e+00 : f32
    %381 = vector.broadcast %cst_89 : f32 to vector<2x1xf32>
    %382 = arith.addf %381, %380 : vector<2x1xf32>
    %383 = arith.divf %381, %382 : vector<2x1xf32>
    %c0_90 = arith.constant 0 : index
    %c0_91 = arith.constant 0 : index
    %384 = vector.load %arg13[%c0_90, %c0_91] : memref<2x1xf32, #tpu.memory_space<vmem>>, vector<2x1xf32>
    tpu.vector_store %arg13[%c0_90, %c0_91], %383 {strides = array<i32>} : memref<2x1xf32, #tpu.memory_space<vmem>>, vector<2x1xf32>,
    return
  }
}

</mosaic_0001>

<bundles_post_ra>
// kernel: lstm_module_forward.1
= control target key start
LH: loop header
LB: loop body
LE: loop exit
PB: predicated region body
PF: predicated region fallthrough
CT: control target
= control target key end

     0   :  { %vm63_vm0 = vcmask 1043456   ;;  %vm56_vm1 = vcmask 31744   ;;  %v4108_v3 = vmov 0.0|0.0   ;;  %vm4109_vm2 = vmmov 0   ;;  %s4111_s21 = smov 32   ;;  %s4794_s1 = inlined_call_operand.vmem [shape: f32[4,128], index: 1, kind: input, shape index: {}]   ;;  %s4795_s0 = inlined_call_operand.vmem [shape: f32[16,4], index: 0, kind: input, shape index: {}]   ;;  %s4796_s2 = inlined_call_operand.vmem [shape: f32[32,128], index: 2, kind: input, shape index: {}]   ;;  %s4797_s3 = inlined_call_operand.vmem [shape: f32[1,128], index: 3, kind: input, shape index: {}]   ;;  %s4798_s4 = inlined_call_operand.vmem [shape: f32[32,128], index: 4, kind: input, shape index: {}]   ;;  %s4799_s5 = inlined_call_operand.vmem [shape: f32[32,128], index: 5, kind: input, shape index: {}]   ;;  %s4800_s6 = inlined_call_operand.vmem [shape: f32[1,128], index: 6, kind: input, shape index: {}]   ;;  %s4801_s7 = inlined_call_operand.vmem [shape: f32[256,128], index: 7, kind: input, shape index: {}]   ;;  %s4802_s9 = inlined_call_operand.vmem [shape: f32[128,64], index: 9, kind: input, shape index: {}]   ;;  %s4803_s8 = inlined_call_operand.vmem [shape: f32[1,128], index: 8, kind: input, shape index: {}]   ;;  %s4804_s12 = inlined_call_operand.<no memory space> [shape: f32[1,1], index: 12, kind: input, shape index: {}]   ;;  %s4805_s10 = inlined_call_operand.vmem [shape: f32[1,64], index: 10, kind: input, shape index: {}]   ;;  %s4806_s11 = inlined_call_operand.vmem [shape: f32[1,64], index: 11, kind: input, shape index: {}]   ;;  %s4807_s13 = inlined_call_operand.vmem [shape: f32[2,1], index: 13, kind: output, shape index: {}]  }
   0x1   :  { %v48_v0 = vld [vmem:[%s4794_s1] sm:$0xf]  ;;  %v47_v2 = vld [vmem:[%s4795_s0 + $0x8] sm:$0xff]  ;;  %3755 = vmatprep.subr.bf16.mxu1 %v4108_v3  ;;  %v144_v6 = vld [vmem:[%s4796_s2 + $0x10] sm:$0xff]  ;;  %v4110_v9 = vmov 0.0   ;;  %vm146_vm3 = vcmask 261120  }
   0x2   :  { %v46_v1 = vld [vmem:[%s4795_s0] sm:$0xff]  ;;  %3339 = vmatprep.subr.msk.mxu0 %vm63_vm0, %v48_v0  ;;  %v143_v5 = vld [vmem:[%s4796_s2 + $0x8] sm:$0xff]  ;;  %v145_v8 = vld [vmem:[%s4796_s2 + $0x18] sm:$0xff]  ;;  %3396 = vmatprep.mubr.msk.f32.mxu1 %vm4109_vm2, %v4110_v9  ;;  %vm3079_vm4 = vcmask 517120   ;;  %vm3097_vm5 = vcmask 1024  }
   0x3   :  { %3341 = vmatprep.mubr.msk.f32.mxu0 %vm56_vm1, %v46_v1  ;;  %v142_v4 = vld [vmem:[%s4796_s2] sm:$0xff]  ;;  %3340 = vmatpush3.msk.msra.mxu0 %vm63_vm0, %v48_v0  ;;  %v4213_v10 = vpack.c.bf16 %v145_v8, %v144_v6 }
   0x4   :  { %v4203_v7 = vpack.c.bf16 %v143_v5, %v142_v4  ;;  %3342 = vmatmul.mubr.msk.f32.vlgmr.msra.gmra.mrb[0].mxu0 %vm56_vm1, %v47_v2  ;;  %3731 = vmatprep.subr.bf16.mxu0 %v4108_v3  ;;  %v3103_v11 = vld [vmem:[%s4797_s3] ss:$0 sm:$0xff]  ;;  %s4112_s3 = smov 64  }
   0x5   :  { %3352 = vmatprep.mubr.msk.f32.mxu0 %vm4109_vm2, %v4110_v9 }
   0x6   :  { %3733 = vmatpush3.bf16.msra.mxu0 %v4203_v7  ;;  %3757 = vmatpush3.bf16.msra.mxu1 %v4203_v7 }
   0x7   :  { %3734 = vmatprep.subr.bf16.mxu0 %v4108_v3  ;;  %3758 = vmatprep.subr.bf16.mxu1 %v4108_v3 }
   0xa   :  { %3736 = vmatpush3.bf16.msra.mxu0 %v4213_v10  ;;  %3760 = vmatpush3.bf16.msra.mxu1 %v4213_v10 }
   0xb   :  { %3737 = vmatprep.subr.bf16.mxu0 %v4108_v3  ;;  %3767 = vmatprep.subr.bf16.mxu1 %v4108_v3 }
   0xd   :  { %3353 = vmatmul.mubr.f32.vlgmr.msra.gmra.mrb[2].mxu0 %v4110_v9 }
   0xe   :  { %3739 = vmatpush3.bf16.msra.mxu0 %v4203_v7  ;;  %3363 = vmatprep.mubr.msk.f32.mxu0 %vm4109_vm2, %v4110_v9 }
   0xf   :  { %3740 = vmatprep.subr.bf16.mxu0 %v4108_v3 }
  0x12   :  { %3742 = vmatpush3.bf16.msra.mxu0 %v4213_v10 }
  0x13   :  { %3743 = vmatprep.subr.bf16.mxu0 %v4108_v3 }
  0xd7   :  { %v3343_v12 = vpop.f32.mrb[0].mxu0 }
  0xd8   :  { %v4234_v13 = vadd.f32 %v3343_v12, %v3103_v11  ;;  %v133_v14 = vpop.f32.mrb[1].mxu0 }
  0xd9   :  { %v4236_v15 = vadd.f32 %v3103_v11, %v133_v14 }
  0xe0   :  { %v216_v16 = vpop.f32.mrb[2].mxu0 }
  0xe1   :  { %v220_v17 = vadd.f32 %v216_v16, %v4236_v15  ;;  %v3354_v18 = vpop.f32.mrb[3].mxu0 }
  0xe3   :  { %3976 = vtanh.f32 %v220_v17  ;;  %v3107_v20 = vmul.f32 -1.442695, %v220_v17 }
  0xe5   :  { %3978 = vpow2.f32 %v3107_v20 }
  0xed   :  { %v3977_v19 = vpop.eup %3976 }
  0xee   :  { %230 = vrot.lane.b32.xlu0 %v3977_v19, %s4111_s21 }
  0xef   :  { %v3979_v21 = vpop.eup %3978 }
  0xf0   :  { %v224_v22 = vadd.f32 1.0, %v3979_v21 }
  0xf2   :  { %3980 = vrcp.f32 %v224_v22 }
  0xfc   :  { %v3981_v23 = vpop.eup %3980 }
  0xfd   :  { %v228_v26 = vmul.f32 0.0, %v3981_v23 }
 0x160   :  { %v231_v24 = vpop.permute.xlu0 %230 }
 0x161   :  { %v233_v25 = vmul.f32 %v3981_v23, %v231_v24 }
 0x163   :  { %235 = vrot.lane.b32.xlu0 %v233_v25, %s4111_s21 }
 0x1d5   :  { %v236_v27 = vpop.permute.xlu0 %235 }
 0x1d6   :  { %v238_v28 = vadd.f32 %v236_v27, %v228_v26 }
 0x1d8   :  { %3982 = vtanh.f32 %v238_v28  ;;  %v332_v44 = vrot.slane %v238_v28, 6 }
 0x1e2   :  { %v3983_v29 = vpop.eup %3982 }
 0x1e3   :  { %241 = vrot.lane.b32.xlu1 %v3983_v29, %s4111_s21 }
 0x255   :  { %v242_v30 = vpop.permute.xlu1 %241 }
 0x256   :  { %v244_v31 = vmul.f32 %v3981_v23, %v242_v30 }
 0x258   :  { %246 = vrot.lane.b32.xlu1 %v244_v31, %s4112_s3 }
 0x2ca   :  { %v4243_v32 = vpop.permute.xlu1 %246 }
 0x2cb   :  { %3364 = vmatmul.mubr.msk.f32.vlgmr.msra.gmra.mrb[4].mxu0 %vm146_vm3, %v4243_v32 }
 0x2cc   :  { %3745 = vmatpush3.bf16.msra.mxu0 %v4203_v7  ;;  %3374 = vmatprep.mubr.msk.f32.mxu0 %vm4109_vm2, %v4110_v9 }
 0x2cd   :  { %3746 = vmatprep.subr.bf16.mxu0 %v4108_v3 }
 0x2d0   :  { %3748 = vmatpush3.bf16.msra.mxu0 %v4213_v10 }
 0x2d1   :  { %3749 = vmatprep.subr.bf16.mxu0 %v4108_v3 }
 0x39e   :  { %v316_v33 = vpop.f32.mrb[4].mxu0 }
 0x39f   :  { %v321_v34 = vrot.slane %v316_v33, 6  ;;  %v3365_v35 = vpop.f32.mrb[5].mxu0 }
 0x3a1   :  { %v323_v36 = vadd.f32 %v321_v34, %v4236_v15 }
 0x3a3   :  { %3984 = vtanh.f32 %v323_v36  ;;  %v3109_v38 = vmul.f32 -1.442695, %v323_v36 }
 0x3a5   :  { %3986 = vpow2.f32 %v3109_v38 }
 0x3ad   :  { %v3985_v37 = vpop.eup %3984 }
 0x3ae   :  { %336 = vrot.lane.b32.xlu0 %v3985_v37, %s4111_s21 }
 0x3af   :  { %v3987_v39 = vpop.eup %3986 }
 0x3b0   :  { %v327_v40 = vadd.f32 1.0, %v3987_v39 }
 0x3b2   :  { %3988 = vrcp.f32 %v327_v40 }
 0x3bc   :  { %v3989_v41 = vpop.eup %3988 }
 0x3bd   :  { %v334_v45 = vmul.f32 %v3989_v41, %v332_v44 }
 0x420   :  { %v337_v42 = vpop.permute.xlu0 %336 }
 0x421   :  { %v339_v43 = vmul.f32 %v3989_v41, %v337_v42 }
 0x423   :  { %341 = vrot.lane.b32.xlu1 %v339_v43, %s4111_s21 }
 0x495   :  { %v342_v46 = vpop.permute.xlu1 %341 }
 0x496   :  { %v344_v47 = vadd.f32 %v342_v46, %v334_v45 }
 0x498   :  { %3990 = vtanh.f32 %v344_v47  ;;  %v439_v0 = vrot.slane %v344_v47, 6 }
 0x4a2   :  { %v3991_v48 = vpop.eup %3990 }
 0x4a3   :  { %347 = vrot.lane.b32.xlu0 %v3991_v48, %s4111_s21 }
 0x515   :  { %v348_v49 = vpop.permute.xlu0 %347 }
 0x516   :  { %v350_v50 = vmul.f32 %v3989_v41, %v348_v49 }
 0x518   :  { %v352_v51 = vrot.slane %v350_v50, 2 }
 0x51a   :  { %353 = vrot.lane.b32.xlu1 %v352_v51, %s4112_s3 }
 0x58c   :  { %v4258_v52 = vpop.permute.xlu1 %353 }
 0x58d   :  { %3375 = vmatmul.mubr.msk.f32.vlgmr.msra.gmra.mrb[6].mxu0 %vm146_vm3, %v4258_v52 }
 0x58e   :  { %3751 = vmatpush3.bf16.msra.mxu0 %v4203_v7  ;;  %3385 = vmatprep.mubr.msk.f32.mxu0 %vm4109_vm2, %v4110_v9 }
 0x58f   :  { %3752 = vmatprep.subr.bf16.mxu0 %v4108_v3 }
 0x592   :  { %3754 = vmatpush3.bf16.msra.mxu0 %v4213_v10 }
 0x593   :  { %3761 = vmatprep.subr.bf16.mxu0 %v4108_v3 }
 0x660   :  { %v423_v53 = vpop.f32.mrb[6].mxu0 }
 0x661   :  { %v428_v54 = vrot.slane %v423_v53, 4  ;;  %v3376_v55 = vpop.f32.mrb[7].mxu0 }
 0x663   :  { %v430_v56 = vadd.f32 %v428_v54, %v4236_v15 }
 0x665   :  { %3992 = vtanh.f32 %v430_v56  ;;  %v3111_v58 = vmul.f32 -1.442695, %v430_v56 }
 0x667   :  { %3994 = vpow2.f32 %v3111_v58 }
 0x66f   :  { %v3993_v57 = vpop.eup %3992 }
 0x670   :  { %443 = vrot.lane.b32.xlu0 %v3993_v57, %s4111_s21 }
 0x671   :  { %v3995_v59 = vpop.eup %3994 }
 0x672   :  { %v434_v60 = vadd.f32 1.0, %v3995_v59 }
 0x674   :  { %3996 = vrcp.f32 %v434_v60 }
 0x67e   :  { %v3997_v61 = vpop.eup %3996 }
 0x67f   :  { %v441_v1 = vmul.f32 %v3997_v61, %v439_v0 }
 0x6e2   :  { %v444_v62 = vpop.permute.xlu0 %443 }
 0x6e3   :  { %v446_v63 = vmul.f32 %v3997_v61, %v444_v62 }
 0x6e5   :  { %448 = vrot.lane.b32.xlu1 %v446_v63, %s4111_s21 }
 0x757   :  { %v449_v2 = vpop.permute.xlu1 %448 }
 0x758   :  { %v451_v4 = vadd.f32 %v449_v2, %v441_v1 }
 0x75a   :  { %3998 = vtanh.f32 %v451_v4  ;;  %v546_v26 = vrot.slane %v451_v4, 6 }
 0x764   :  { %v3999_v5 = vpop.eup %3998 }
 0x765   :  { %454 = vrot.lane.b32.xlu0 %v3999_v5, %s4111_s21 }
 0x7d7   :  { %v455_v6 = vpop.permute.xlu0 %454 }
 0x7d8   :  { %v457_v8 = vmul.f32 %v3997_v61, %v455_v6 }
 0x7da   :  { %v459_v11 = vrot.slane %v457_v8, 4 }
 0x7dc   :  { %460 = vrot.lane.b32.xlu1 %v459_v11, %s4112_s3  ;;  %v993_v11 = vld [vmem:[%s4798_s4] sm:$0xff] }
 0x84e   :  { %v4273_v12 = vpop.permute.xlu1 %460 }
 0x84f   :  { %3386 = vmatmul.mubr.msk.f32.vlgmr.msra.gmra.mrb[8].mxu0 %vm146_vm3, %v4273_v12 }
 0x850   :  { %3763 = vmatpush3.bf16.msra.mxu0 %v4203_v7  ;;  %3407 = vmatprep.mubr.msk.f32.mxu0 %vm4109_vm2, %v4110_v9 }
 0x851   :  { %3764 = vmatprep.subr.bf16.mxu0 %v4108_v3 }
 0x854   :  { %3766 = vmatpush3.bf16.msra.mxu0 %v4213_v10 }
 0x855   :  { %3773 = vmatprep.subr.bf16.mxu0 %v4108_v3 }
 0x922   :  { %v530_v14 = vpop.f32.mrb[8].mxu0 }
 0x923   :  { %v535_v16 = vrot.slane %v530_v14, 2  ;;  %v3387_v17 = vpop.f32.mrb[9].mxu0  ;;  %v994_v14 = vld [vmem:[%s4798_s4 + $0x8] sm:$0xff] }
 0x924   :  { %v995_v17 = vld [vmem:[%s4798_s4 + $0x10] sm:$0xff] }
 0x925   :  { %v537_v18 = vadd.f32 %v535_v16, %v4236_v15  ;;  %v4327_v16 = vpack.c.bf16 %v994_v14, %v993_v11 }
 0x927   :  { %4000 = vtanh.f32 %v537_v18  ;;  %v3113_v20 = vmul.f32 -1.442695, %v537_v18  ;;  %v996_v18 = vld [vmem:[%s4798_s4 + $0x18] sm:$0xff] }
 0x929   :  { %4002 = vpow2.f32 %v3113_v20  ;;  %v4340_v20 = vpack.c.bf16 %v996_v18, %v995_v17 }
 0x931   :  { %v4001_v19 = vpop.eup %4000 }
 0x932   :  { %550 = vrot.lane.b32.xlu0 %v4001_v19, %s4111_s21 }
 0x933   :  { %v4003_v21 = vpop.eup %4002 }
 0x934   :  { %v541_v22 = vadd.f32 1.0, %v4003_v21  ;;  %v989_v21 = vld [vmem:[%s4799_s5] sm:$0xff] }
 0x936   :  { %4004 = vrcp.f32 %v541_v22  ;;  %v990_v22 = vld [vmem:[%s4799_s5 + $0x8] sm:$0xff] }
 0x940   :  { %v4005_v23 = vpop.eup %4004 }
 0x941   :  { %v548_v27 = vmul.f32 %v4005_v23, %v546_v26 }
 0x9a4   :  { %v551_v24 = vpop.permute.xlu0 %550 }
 0x9a5   :  { %v553_v25 = vmul.f32 %v4005_v23, %v551_v24  ;;  %v991_v24 = vld [vmem:[%s4799_s5 + $0x10] sm:$0xff] }
 0x9a7   :  { %555 = vrot.lane.b32.xlu1 %v553_v25, %s4111_s21  ;;  %v992_v25 = vld [vmem:[%s4799_s5 + $0x18] sm:$0xff] }
 0x9a8   :  { %v4364_v26 = vpack.c.bf16 %v992_v25, %v991_v24 }
 0xa19   :  { %v556_v28 = vpop.permute.xlu1 %555 }
 0xa1a   :  { %v558_v29 = vadd.f32 %v556_v28, %v548_v27 }
 0xa1c   :  { %4006 = vtanh.f32 %v558_v29  ;;  %v650_v45 = vrot.slane %v558_v29, 6 }
 0xa26   :  { %v4007_v15 = vpop.eup %4006 }
 0xa27   :  { %561 = vrot.lane.b32.xlu0 %v4007_v15, %s4111_s21 }
 0xa99   :  { %v562_v30 = vpop.permute.xlu0 %561 }
 0xa9a   :  { %v564_v31 = vmul.f32 %v4005_v23, %v562_v30  ;;  %v4352_v23 = vpack.c.bf16 %v990_v22, %v989_v21 }
 0xa9c   :  { %v566_v33 = vrot.slane %v564_v31, 6 }
 0xa9e   :  { %567 = vrot.lane.b32.xlu1 %v566_v33, %s4112_s3 }
 0xb10   :  { %v4288_v34 = vpop.permute.xlu1 %567 }
 0xb11   :  { %3397 = vmatmul.mubr.msk.f32.vlgmr.msra.gmra.mrb[0].mxu1 %vm146_vm3, %v4288_v34 }
 0xb12   :  { %3769 = vmatpush3.bf16.msra.mxu1 %v4203_v7  ;;  %3418 = vmatprep.mubr.msk.f32.mxu1 %vm4109_vm2, %v4110_v9 }
 0xb13   :  { %3770 = vmatprep.subr.bf16.mxu1 %v4108_v3 }
 0xb16   :  { %3772 = vmatpush3.bf16.msra.mxu1 %v4213_v10 }
 0xb17   :  { %3779 = vmatprep.subr.bf16.mxu1 %v4108_v3 }
 0xbe4   :  { %v637_v35 = vpop.f32.mrb[0].mxu1 }
 0xbe5   :  { %v641_v36 = vadd.f32 %v637_v35, %v4234_v13  ;;  %v3398_v37 = vpop.f32.mrb[1].mxu1 }
 0xbe7   :  { %4008 = vtanh.f32 %v641_v36  ;;  %v3115_v39 = vmul.f32 -1.442695, %v641_v36 }
 0xbe9   :  { %4010 = vpow2.f32 %v3115_v39 }
 0xbf1   :  { %v4009_v38 = vpop.eup %4008 }
 0xbf2   :  { %654 = vrot.lane.b32.xlu0 %v4009_v38, %s4111_s21 }
 0xbf3   :  { %v4011_v40 = vpop.eup %4010 }
 0xbf4   :  { %v645_v41 = vadd.f32 1.0, %v4011_v40 }
 0xbf6   :  { %4012 = vrcp.f32 %v645_v41 }
 0xc00   :  { %v4013_v42 = vpop.eup %4012 }
 0xc01   :  { %v652_v46 = vmul.f32 %v4013_v42, %v650_v45 }
 0xc64   :  { %v655_v43 = vpop.permute.xlu0 %654 }
 0xc65   :  { %v657_v44 = vmul.f32 %v4013_v42, %v655_v43 }
 0xc67   :  { %659 = vrot.lane.b32.xlu1 %v657_v44, %s4111_s21 }
 0xcd9   :  { %v660_v47 = vpop.permute.xlu1 %659 }
 0xcda   :  { %v662_v48 = vadd.f32 %v660_v47, %v652_v46 }
 0xcdc   :  { %4014 = vtanh.f32 %v662_v48 }
 0xce6   :  { %v4015_v49 = vpop.eup %4014 }
 0xce7   :  { %665 = vrot.lane.b32.xlu0 %v4015_v49, %s4111_s21 }
 0xd59   :  { %v666_v50 = vpop.permute.xlu0 %665 }
 0xd5a   :  { %v668_v51 = vmul.f32 %v4013_v42, %v666_v50 }
 0xd5c   :  { %670 = vrot.lane.b32.xlu1 %v668_v51, %s4112_s3 }
 0xdce   :  { %v4303_v53 = vpop.permute.xlu1 %670 }
 0xdcf   :  { %3408 = vmatmul.mubr.msk.f32.vlgmr.msra.gmra.mrb[10].mxu0 %vm146_vm3, %v4303_v53 }
 0xdd0   :  { %3775 = vmatpush3.bf16.msra.mxu0 %v4203_v7  ;;  %3429 = vmatprep.mubr.msk.f32.mxu0 %vm4109_vm2, %v4110_v9 }
 0xdd1   :  { %3776 = vmatprep.subr.bf16.mxu0 %v4108_v3 }
 0xdd4   :  { %3778 = vmatpush3.bf16.msra.mxu0 %v4213_v10  ;;  %v756_v10 = vrot.slane %v662_v48, 6 }
 0xdd5   :  { %3791 = vmatprep.subr.bf16.mxu0 %v4108_v3 }
 0xea2   :  { %v740_v54 = vpop.f32.mrb[10].mxu0 }
 0xea3   :  { %v745_v55 = vrot.slane %v740_v54, 6  ;;  %v3409_v56 = vpop.f32.mrb[11].mxu0 }
 0xea5   :  { %v747_v57 = vadd.f32 %v745_v55, %v4234_v13 }
 0xea7   :  { %4016 = vtanh.f32 %v747_v57  ;;  %v3117_v59 = vmul.f32 -1.442695, %v747_v57 }
 0xea9   :  { %4018 = vpow2.f32 %v3117_v59 }
 0xeb1   :  { %v4017_v58 = vpop.eup %4016 }
 0xeb2   :  { %760 = vrot.lane.b32.xlu0 %v4017_v58, %s4111_s21 }
 0xeb3   :  { %v4019_v7 = vpop.eup %4018 }
 0xeb4   :  { %v751_v60 = vadd.f32 1.0, %v4019_v7 }
 0xeb6   :  { %4020 = vrcp.f32 %v751_v60 }
 0xec0   :  { %v4021_v61 = vpop.eup %4020 }
 0xec1   :  { %v758_v0 = vmul.f32 %v4021_v61, %v756_v10 }
 0xf24   :  { %v761_v62 = vpop.permute.xlu0 %760 }
 0xf25   :  { %v763_v63 = vmul.f32 %v4021_v61, %v761_v62 }
 0xf27   :  { %765 = vrot.lane.b32.xlu1 %v763_v63, %s4111_s21 }
 0xf99   :  { %v766_v1 = vpop.permute.xlu1 %765 }
 0xf9a   :  { %v4316_v2 = vadd.f32 %v766_v1, %v758_v0 }
 0xf9c   :  { %4022 = vtanh.f32 %v4316_v2  ;;  %v863_v48 = vrot.slane %v4316_v2, 6 }
 0xfa6   :  { %v4023_v4 = vpop.eup %4022 }
 0xfa7   :  { %771 = vrot.lane.b32.xlu0 %v4023_v4, %s4111_s21 }
0x1019   :  { %v772_v5 = vpop.permute.xlu0 %771 }
0x101a   :  { %v774_v6 = vmul.f32 %v4021_v61, %v772_v5 }
0x101c   :  { %v776_v8 = vrot.slane %v774_v6, 2 }
0x101e   :  { %777 = vrot.lane.b32.xlu1 %v776_v8, %s4112_s3 }
0x1090   :  { %v4335_v19 = vpop.permute.xlu1 %777 }
0x1091   :  { %3419 = vmatmul.mubr.msk.f32.vlgmr.msra.gmra.mrb[2].mxu1 %vm146_vm3, %v4335_v19 }
0x1092   :  { %3781 = vmatpush3.bf16.msra.mxu1 %v4327_v16  ;;  %3440 = vmatprep.mubr.msk.f32.mxu1 %vm4109_vm2, %v4110_v9 }
0x1093   :  { %3782 = vmatprep.subr.bf16.mxu1 %v4108_v3 }
0x1096   :  { %3784 = vmatpush3.bf16.msra.mxu1 %v4340_v20 }
0x1097   :  { %3785 = vmatprep.subr.bf16.mxu1 %v4108_v3 }
0x1099   :  { %3441 = vmatmul.mubr.msk.f32.vlgmr.msra.gmra.mrb[4].mxu1 %vm146_vm3, %v4243_v32 }
0x109a   :  { %3787 = vmatpush3.bf16.msra.mxu1 %v4352_v23  ;;  %3451 = vmatprep.mubr.msk.f32.mxu1 %vm4109_vm2, %v4110_v9 }
0x109b   :  { %3788 = vmatprep.subr.bf16.mxu1 %v4108_v3 }
0x109e   :  { %3790 = vmatpush3.bf16.msra.mxu1 %v4364_v26 }
0x109f   :  { %3803 = vmatprep.subr.bf16.mxu1 %v4108_v3 }
0x10a1   :  { %3452 = vmatmul.mubr.f32.vlgmr.msra.gmra.mrb[4].mxu1 %v4110_v9 }
0x10a2   :  { %3805 = vmatpush3.bf16.msra.mxu1 %v4327_v16  ;;  %3484 = vmatprep.mubr.msk.f32.mxu1 %vm4109_vm2, %v4110_v9 }
0x10a3   :  { %3806 = vmatprep.subr.bf16.mxu1 %v4108_v3 }
0x10a6   :  { %3808 = vmatpush3.bf16.msra.mxu1 %v4340_v20 }
0x10a7   :  { %3809 = vmatprep.subr.bf16.mxu1 %v4108_v3 }
0x10a9   :  { %3485 = vmatmul.mubr.msk.f32.vlgmr.msra.gmra.mrb[6].mxu1 %vm146_vm3, %v4273_v12  ;;  %v4390_v12 = vld [vmem:[%s4800_s6] ss:$0 sm:$0xff] }
0x10aa   :  { %3811 = vmatpush3.bf16.msra.mxu1 %v4352_v23  ;;  %3495 = vmatprep.mubr.msk.f32.mxu1 %vm4109_vm2, %v4110_v9 }
0x10ab   :  { %3812 = vmatprep.subr.bf16.mxu1 %v4108_v3 }
0x10ae   :  { %3814 = vmatpush3.bf16.msra.mxu1 %v4364_v26 }
0x10af   :  { %3827 = vmatprep.subr.bf16.mxu1 %v4108_v3 }
0x1164   :  { %v847_v32 = vpop.f32.mrb[2].mxu1 }
0x1165   :  { %v852_v27 = vrot.slane %v847_v32, 4  ;;  %v3420_v28 = vpop.f32.mrb[3].mxu1 }
0x1167   :  { %v854_v29 = vadd.f32 %v852_v27, %v4234_v13 }
0x1169   :  { %4024 = vtanh.f32 %v854_v29  ;;  %v3119_v36 = vmul.f32 -1.442695, %v854_v29 }
0x1173   :  { %v4025_v15 = vpop.eup %4024 }
0x1174   :  { %v1140_v30 = vpop.f32.mrb[4].mxu1  ;;  %867 = vrot.lane.b32.xlu0 %v4025_v15, %s4111_s21 }
0x1175   :  { %v3947_v31 = vadd.f32 %v4390_v12, %v1140_v30  ;;  %v3453_v33 = vpop.f32.mrb[5].mxu1 }
0x1177   :  { %4026 = vtanh.f32 %v3947_v31  ;;  %v3124_v38 = vmul.f32 -1.442695, %v3947_v31 }
0x1178   :  { %4028 = vpow2.f32 %v3119_v36 }
0x1179   :  { %4030 = vpow2.f32 %v3124_v38 }
0x1181   :  { %v4027_v35 = vpop.eup %4026 }
0x1182   :  { %1154 = vrot.lane.b32.xlu1 %v4027_v35, %s4111_s21  ;;  %v4029_v37 = vpop.eup %4028 }
0x1183   :  { %v858_v39 = vadd.f32 1.0, %v4029_v37  ;;  %v4031_v40 = vpop.eup %4030 }
0x1184   :  { %v1148_v42 = vadd.f32 1.0, %v4031_v40 }
0x1185   :  { %4032 = vrcp.f32 %v858_v39 }
0x1186   :  { %4034 = vrcp.f32 %v1148_v42 }
0x118f   :  { %v4033_v41 = vpop.eup %4032 }
0x1190   :  { %v4035_v45 = vpop.eup %4034  ;;  %v865_v49 = vmul.f32 %v4033_v41, %v863_v48 }
0x1191   :  { %v1152_v55 = vmul.f32 0.0, %v4035_v45 }
0x11e6   :  { %v868_v43 = vpop.permute.xlu0 %867 }
0x11e7   :  { %v870_v44 = vmul.f32 %v4033_v41, %v868_v43 }
0x11e9   :  { %872 = vrot.lane.b32.xlu0 %v870_v44, %s4111_s21 }
0x11f4   :  { %v1155_v46 = vpop.permute.xlu1 %1154 }
0x11f5   :  { %v1157_v47 = vmul.f32 %v4035_v45, %v1155_v46 }
0x11f7   :  { %1159 = vrot.lane.b32.xlu1 %v1157_v47, %s4111_s21 }
0x125b   :  { %v873_v50 = vpop.permute.xlu0 %872 }
0x125c   :  { %v4398_v51 = vadd.f32 %v873_v50, %v865_v49 }
0x125e   :  { %4036 = vtanh.f32 %v4398_v51 }
0x1268   :  { %v4037_v54 = vpop.eup %4036 }
0x1269   :  { %v1160_v56 = vpop.permute.xlu1 %1159  ;;  %878 = vrot.lane.b32.xlu0 %v4037_v54, %s4111_s21 }
0x126a   :  { %v1162_v57 = vadd.f32 %v1160_v56, %v1152_v55 }
0x126c   :  { %4038 = vtanh.f32 %v1162_v57 }
0x1276   :  { %v4039_v58 = vpop.eup %4038 }
0x1277   :  { %1165 = vrot.lane.b32.xlu1 %v4039_v58, %s4111_s21 }
0x12db   :  { %v879_v59 = vpop.permute.xlu0 %878 }
0x12dc   :  { %v881_v7 = vmul.f32 %v4033_v41, %v879_v59 }
0x12de   :  { %v883_v60 = vrot.slane %v881_v7, 4 }
0x12e0   :  { %884 = vrot.lane.b32.xlu0 %v883_v60, %s4112_s3 }
0x12e9   :  { %v1166_v61 = vpop.permute.xlu1 %1165 }
0x12ea   :  { %v1168_v62 = vmul.f32 %v4035_v45, %v1166_v61 }
0x12ec   :  { %1240 = vrot.lane.b32.xlu1 %v1168_v62, %s4112_s3 }
0x1352   :  { %v4405_v63 = vpop.permute.xlu0 %884 }
0x1353   :  { %3430 = vmatmul.mubr.msk.f32.vlgmr.msra.gmra.mrb[12].mxu0 %vm146_vm3, %v4405_v63 }
0x1354   :  { %3793 = vmatpush3.bf16.msra.mxu0 %v4327_v16  ;;  %3462 = vmatprep.mubr.msk.f32.mxu0 %vm4109_vm2, %v4110_v9 }
0x1355   :  { %3794 = vmatprep.subr.bf16.mxu0 %v4108_v3 }
0x1358   :  { %3796 = vmatpush3.bf16.msra.mxu0 %v4340_v20 }
0x1359   :  { %3797 = vmatprep.subr.bf16.mxu0 %v4108_v3 }
0x135b   :  { %3463 = vmatmul.mubr.msk.f32.vlgmr.msra.gmra.mrb[14].mxu0 %vm146_vm3, %v4258_v52 }
0x135c   :  { %3799 = vmatpush3.bf16.msra.mxu0 %v4352_v23  ;;  %3473 = vmatprep.mubr.msk.f32.mxu0 %vm4109_vm2, %v4110_v9 }
0x135d   :  { %3800 = vmatprep.subr.bf16.mxu0 %v4108_v3 }
0x135e   :  { %v4423_v10 = vpop.permute.xlu1 %1240 }
0x1360   :  { %3802 = vmatpush3.bf16.msra.mxu0 %v4364_v26 }
0x1361   :  { %3815 = vmatprep.subr.bf16.mxu0 %v4108_v3 }
0x1363   :  { %3474 = vmatmul.mubr.msk.f32.vlgmr.msra.gmra.mrb[14].mxu0 %vm146_vm3, %v4423_v10 }
0x1364   :  { %3817 = vmatpush3.bf16.msra.mxu0 %v4327_v16  ;;  %3506 = vmatprep.mubr.msk.f32.mxu0 %vm4109_vm2, %v4110_v9 }
0x1365   :  { %3818 = vmatprep.subr.bf16.mxu0 %v4108_v3 }
0x1368   :  { %3820 = vmatpush3.bf16.msra.mxu0 %v4340_v20 }
0x1369   :  { %3821 = vmatprep.subr.bf16.mxu0 %v4108_v3 }
0x136b   :  { %3507 = vmatmul.mubr.msk.f32.vlgmr.msra.gmra.mrb[16].mxu0 %vm146_vm3, %v4288_v34 }
0x136c   :  { %3823 = vmatpush3.bf16.msra.mxu0 %v4352_v23  ;;  %3517 = vmatprep.mubr.msk.f32.mxu0 %vm4109_vm2, %v4110_v9 }
0x136d   :  { %3824 = vmatprep.subr.bf16.mxu0 %v4108_v3 }
0x1370   :  { %3826 = vmatpush3.bf16.msra.mxu0 %v4364_v26 }
0x1371   :  { %3839 = vmatprep.subr.bf16.mxu0 %v4108_v3 }
0x1426   :  { %v4441_v52 = vpop.f32.mrb[12].mxu0 }
0x1427   :  { %v3431_v0 = vpop.f32.mrb[13].mxu0 }
0x1436   :  { %v1310_v1 = vpop.f32.mrb[14].mxu0 }
0x1437   :  { %v3948_v2 = vadd.f32 %v4390_v12, %v1310_v1  ;;  %v3475_v4 = vpop.f32.mrb[15].mxu0 }
0x1439   :  { %4040 = vtanh.f32 %v3948_v2  ;;  %v3127_v5 = vmul.f32 -1.442695, %v3948_v2 }
0x143b   :  { %4042 = vpow2.f32 %v3127_v5 }
0x1443   :  { %v4041_v34 = vpop.eup %4040 }
0x1444   :  { %1324 = vrot.lane.b32.xlu0 %v4041_v34, %s4111_s21 }
0x1445   :  { %v4043_v6 = vpop.eup %4042 }
0x1446   :  { %v1318_v8 = vadd.f32 1.0, %v4043_v6 }
0x1448   :  { %4044 = vrcp.f32 %v1318_v8 }
0x1452   :  { %v4045_v11 = vpop.eup %4044 }
0x1453   :  { %v1322_v18 = vmul.f32 %v4045_v11, %v1162_v57 }
0x14b6   :  { %v1325_v14 = vpop.permute.xlu0 %1324 }
0x14b7   :  { %v1327_v17 = vmul.f32 %v4045_v11, %v1325_v14 }
0x14b9   :  { %1329 = vrot.lane.b32.xlu1 %v1327_v17, %s4111_s21 }
0x152b   :  { %v1330_v21 = vpop.permute.xlu1 %1329 }
0x152c   :  { %v1332_v22 = vadd.f32 %v1330_v21, %v1322_v18 }
0x152e   :  { %4046 = vtanh.f32 %v1332_v22 }
0x1538   :  { %v4047_v24 = vpop.eup %4046 }
0x1539   :  { %1335 = vrot.lane.b32.xlu0 %v4047_v24, %s4111_s21 }
0x15ab   :  { %v1336_v25 = vpop.permute.xlu0 %1335 }
0x15ac   :  { %v1338_v32 = vmul.f32 %v4045_v11, %v1336_v25 }
0x15ae   :  { %1410 = vrot.lane.b32.xlu1 %v1338_v32, %s4112_s3 }
0x1620   :  { %v4448_v27 = vpop.permute.xlu1 %1410 }
0x1621   :  { %3496 = vmatmul.mubr.msk.f32.vlgmr.msra.gmra.mrb[6].mxu1 %vm146_vm3, %v4448_v27 }
0x1622   :  { %3829 = vmatpush3.bf16.msra.mxu1 %v4327_v16  ;;  %3528 = vmatprep.mubr.msk.f32.mxu1 %vm4109_vm2, %v4110_v9 }
0x1623   :  { %3830 = vmatprep.subr.bf16.mxu1 %v4108_v3 }
0x1626   :  { %3832 = vmatpush3.bf16.msra.mxu1 %v4340_v20 }
0x1627   :  { %3833 = vmatprep.subr.bf16.mxu1 %v4108_v3 }
0x1629   :  { %3529 = vmatmul.mubr.msk.f32.vlgmr.msra.gmra.mrb[8].mxu1 %vm146_vm3, %v4303_v53 }
0x162a   :  { %3835 = vmatpush3.bf16.msra.mxu1 %v4352_v23  ;;  %3539 = vmatprep.mubr.msk.f32.mxu1 %vm4109_vm2, %v4110_v9 }
0x162b   :  { %3836 = vmatprep.subr.bf16.mxu1 %v4108_v3 }
0x162e   :  { %3838 = vmatpush3.bf16.msra.mxu1 %v4364_v26 }
0x162f   :  { %3851 = vmatprep.subr.bf16.mxu1 %v4108_v3 }
0x16f4   :  { %v1480_v28 = vpop.f32.mrb[6].mxu1 }
0x16f5   :  { %v3949_v29 = vadd.f32 %v4390_v12, %v1480_v28  ;;  %v3497_v15 = vpop.f32.mrb[7].mxu1 }
0x16f7   :  { %4048 = vtanh.f32 %v3949_v29  ;;  %v3130_v53 = vmul.f32 -1.442695, %v3949_v29 }
0x16f9   :  { %4050 = vpow2.f32 %v3130_v53 }
0x1701   :  { %v4049_v30 = vpop.eup %4048 }
0x1702   :  { %1494 = vrot.lane.b32.xlu0 %v4049_v30, %s4111_s21 }
0x1703   :  { %v4051_v31 = vpop.eup %4050 }
0x1704   :  { %v1488_v33 = vadd.f32 1.0, %v4051_v31 }
0x1706   :  { %4052 = vrcp.f32 %v1488_v33 }
0x1710   :  { %v4053_v35 = vpop.eup %4052 }
0x1711   :  { %v1492_v38 = vmul.f32 %v4053_v35, %v1332_v22 }
0x1774   :  { %v1495_v36 = vpop.permute.xlu0 %1494 }
0x1775   :  { %v1497_v37 = vmul.f32 %v4053_v35, %v1495_v36 }
0x1777   :  { %1499 = vrot.lane.b32.xlu1 %v1497_v37, %s4111_s21 }
0x17e9   :  { %v1500_v39 = vpop.permute.xlu1 %1499 }
0x17ea   :  { %v1502_v40 = vadd.f32 %v1500_v39, %v1492_v38 }
0x17ec   :  { %4054 = vtanh.f32 %v1502_v40 }
0x17f6   :  { %v4055_v41 = vpop.eup %4054 }
0x17f7   :  { %1505 = vrot.lane.b32.xlu0 %v4055_v41, %s4111_s21 }
0x1869   :  { %v1506_v42 = vpop.permute.xlu0 %1505 }
0x186a   :  { %v1508_v43 = vmul.f32 %v4053_v35, %v1506_v42 }
0x186c   :  { %1580 = vrot.lane.b32.xlu1 %v1508_v43, %s4112_s3 }
0x18de   :  { %v4471_v44 = vpop.permute.xlu1 %1580 }
0x18df   :  { %3518 = vmatmul.mubr.msk.f32.vlgmr.msra.gmra.mrb[16].mxu0 %vm146_vm3, %v4471_v44 }
0x18e0   :  { %3841 = vmatpush3.bf16.msra.mxu0 %v4327_v16  ;;  %3550 = vmatprep.mubr.msk.f32.mxu0 %vm4109_vm2, %v4110_v9 }
0x18e1   :  { %3842 = vmatprep.subr.bf16.mxu0 %v4108_v3 }
0x18e4   :  { %3844 = vmatpush3.bf16.msra.mxu0 %v4340_v20 }
0x18e5   :  { %3845 = vmatprep.subr.bf16.mxu0 %v4108_v3 }
0x18e7   :  { %3551 = vmatmul.mubr.msk.f32.vlgmr.msra.gmra.mrb[18].mxu0 %vm146_vm3, %v4335_v19 }
0x18e8   :  { %3847 = vmatpush3.bf16.msra.mxu0 %v4352_v23  ;;  %3561 = vmatprep.mubr.msk.f32.mxu0 %vm4109_vm2, %v4110_v9 }
0x18e9   :  { %3848 = vmatprep.subr.bf16.mxu0 %v4108_v3 }
0x18ec   :  { %3850 = vmatpush3.bf16.msra.mxu0 %v4364_v26 }
0x18ed   :  { %3863 = vmatprep.subr.bf16.mxu0 %v4108_v3 }
0x19b2   :  { %v1650_v45 = vpop.f32.mrb[16].mxu0 }
0x19b3   :  { %v3950_v46 = vadd.f32 %v4390_v12, %v1650_v45  ;;  %v3519_v47 = vpop.f32.mrb[17].mxu0 }
0x19b5   :  { %4056 = vtanh.f32 %v3950_v46  ;;  %v3133_v19 = vmul.f32 -1.442695, %v3950_v46 }
0x19b7   :  { %4058 = vpow2.f32 %v3133_v19  ;;  %v2369_v19 = vld [vmem:[%s4801_s7 + $0x20] sm:$0xff] }
0x19bf   :  { %v4057_v48 = vpop.eup %4056 }
0x19c0   :  { %1664 = vrot.lane.b32.xlu0 %v4057_v48, %s4111_s21 }
0x19c1   :  { %v4059_v49 = vpop.eup %4058 }
0x19c2   :  { %v1658_v50 = vadd.f32 1.0, %v4059_v49  ;;  %v2370_v49 = vld [vmem:[%s4801_s7 + $0x28] sm:$0xff] }
0x19c4   :  { %4060 = vrcp.f32 %v1658_v50  ;;  %v3876_v50 = vpack.c.bf16 %v2370_v49, %v2369_v19  ;;  %v2367_v19 = vld [vmem:[%s4801_s7 + $0x10] sm:$0xff]  ;;  %v2368_v49 = vld [vmem:[%s4801_s7 + $0x18] sm:$0xff] }
0x19ce   :  { %v4061_v54 = vpop.eup %4060 }
0x19cf   :  { %v1662_v57 = vmul.f32 %v4061_v54, %v1502_v40 }
0x1a32   :  { %v1665_v55 = vpop.permute.xlu0 %1664 }
0x1a33   :  { %v1667_v56 = vmul.f32 %v4061_v54, %v1665_v55  ;;  %v2372_v55 = vld [vmem:[%s4801_s7 + $0x38] sm:$0xff] }
0x1a35   :  { %1669 = vrot.lane.b32.xlu1 %v1667_v56, %s4111_s21 }
0x1aa7   :  { %v1670_v58 = vpop.permute.xlu1 %1669 }
0x1aa8   :  { %v1672_v59 = vadd.f32 %v1670_v58, %v1662_v57  ;;  %v970_v57 = vrot.slane %v4398_v51, 6 }
0x1aaa   :  { %4062 = vtanh.f32 %v1672_v59 }
0x1ab4   :  { %v4063_v7 = vpop.eup %4062 }
0x1ab5   :  { %1675 = vrot.lane.b32.xlu0 %v4063_v7, %s4111_s21  ;;  %v2513_v7 = vld [vmem:[%s4801_s7 + $0x40] sm:$0xff] }
0x1b27   :  { %v1676_v60 = vpop.permute.xlu0 %1675 }
0x1b28   :  { %v1678_v61 = vmul.f32 %v4061_v54, %v1676_v60  ;;  %v2371_v54 = vld [vmem:[%s4801_s7 + $0x30] sm:$0xff]  ;;  %v2514_v60 = vld [vmem:[%s4801_s7 + $0x48] sm:$0xff] }
0x1b29   :  { %v3879_v58 = vpack.c.bf16 %v2372_v55, %v2371_v54  ;;  %v3885_v54 = vpack.c.bf16 %v2368_v49, %v2367_v19  ;;  %v2588_v55 = vld [vmem:[%s4801_s7 + $0x60] sm:$0xff] }
0x1b2a   :  { %1750 = vrot.lane.b32.xlu1 %v1678_v61, %s4112_s3  ;;  %v2985_v49 = vld [vmem:[%s4802_s9 + $0x40] sm:$0xff] }
0x1b9c   :  { %v4494_v62 = vpop.permute.xlu1 %1750 }
0x1b9d   :  { %3540 = vmatmul.mubr.msk.f32.vlgmr.msra.gmra.mrb[8].mxu1 %vm146_vm3, %v4494_v62 }
0x1b9e   :  { %3853 = vmatpush3.bf16.msra.mxu1 %v4327_v16  ;;  %3572 = vmatprep.mubr.msk.f32.mxu1 %vm4109_vm2, %v4110_v9 }
0x1b9f   :  { %3854 = vmatprep.subr.bf16.mxu1 %v4108_v3 }
0x1ba2   :  { %3856 = vmatpush3.bf16.msra.mxu1 %v4340_v20 }
0x1ba3   :  { %3857 = vmatprep.subr.bf16.mxu1 %v4108_v3 }
0x1ba5   :  { %3573 = vmatmul.mubr.msk.f32.vlgmr.msra.gmra.mrb[10].mxu1 %vm146_vm3, %v4405_v63 }
0x1ba6   :  { %3859 = vmatpush3.bf16.msra.mxu1 %v4352_v23  ;;  %3583 = vmatprep.mubr.msk.f32.mxu1 %vm4109_vm2, %v4110_v9 }
0x1ba7   :  { %3860 = vmatprep.subr.bf16.mxu1 %v4108_v3 }
0x1baa   :  { %3862 = vmatpush3.bf16.msra.mxu1 %v4364_v26 }
0x1bab   :  { %3875 = vmatprep.subr.bf16.mxu1 %v4108_v3 }
0x1c70   :  { %v1820_v0 = vpop.f32.mrb[8].mxu1 }
0x1c71   :  { %v3951_v1 = vadd.f32 %v4390_v12, %v1820_v0  ;;  %v3541_v2 = vpop.f32.mrb[9].mxu1  ;;  %v3888_v0 = vpack.c.bf16 %v2514_v60, %v2513_v7  ;;  %v2591_v7 = vld [vmem:[%s4801_s7 + $0x78] sm:$0xff] }
0x1c72   :  { %v2516_v2 = vld [vmem:[%s4801_s7 + $0x58] sm:$0xff] }
0x1c73   :  { %4064 = vtanh.f32 %v3951_v1  ;;  %v3136_v63 = vmul.f32 -1.442695, %v3951_v1  ;;  %v2515_v1 = vld [vmem:[%s4801_s7 + $0x50] sm:$0xff] }
0x1c75   :  { %4066 = vpow2.f32 %v3136_v63  ;;  %v2663_v63 = vld [vmem:[%s4801_s7 + $0x80] sm:$0xff] }
0x1c7d   :  { %v4065_v4 = vpop.eup %4064 }
0x1c7e   :  { %1834 = vrot.lane.b32.xlu0 %v4065_v4, %s4111_s21  ;;  %v3891_v4 = vpack.c.bf16 %v2516_v2, %v2515_v1  ;;  %v2741_v1 = vld [vmem:[%s4801_s7 + $0xb8] sm:$0xff] }
0x1c7f   :  { %v4067_v34 = vpop.eup %4066 }
0x1c80   :  { %v1828_v5 = vadd.f32 1.0, %v4067_v34  ;;  %v2664_v34 = vld [vmem:[%s4801_s7 + $0x88] sm:$0xff] }
0x1c82   :  { %4068 = vrcp.f32 %v1828_v5  ;;  %v3900_v5 = vpack.c.bf16 %v2664_v34, %v2663_v63 }
0x1c8c   :  { %v4069_v6 = vpop.eup %4068 }
0x1c8d   :  { %v1832_v14 = vmul.f32 %v4069_v6, %v1672_v59 }
0x1cf0   :  { %v1835_v8 = vpop.permute.xlu0 %1834 }
0x1cf1   :  { %v1837_v11 = vmul.f32 %v4069_v6, %v1835_v8 }
0x1cf3   :  { %1839 = vrot.lane.b32.xlu1 %v1837_v11, %s4111_s21 }
0x1d65   :  { %v1840_v17 = vpop.permute.xlu1 %1839 }
0x1d66   :  { %v1842_v18 = vadd.f32 %v1840_v17, %v1832_v14 }
0x1d68   :  { %4070 = vtanh.f32 %v1842_v18 }
0x1d72   :  { %v4071_v21 = vpop.eup %4070 }
0x1d73   :  { %1845 = vrot.lane.b32.xlu0 %v4071_v21, %s4111_s21 }
0x1de5   :  { %v1846_v22 = vpop.permute.xlu0 %1845 }
0x1de6   :  { %v1848_v24 = vmul.f32 %v4069_v6, %v1846_v22  ;;  %v2666_v6 = vld [vmem:[%s4801_s7 + $0x98] sm:$0xff] }
0x1de8   :  { %1920 = vrot.lane.b32.xlu1 %v1848_v24, %s4112_s3 }
0x1e5a   :  { %v4517_v25 = vpop.permute.xlu1 %1920 }
0x1e5b   :  { %3562 = vmatmul.mubr.msk.f32.vlgmr.msra.gmra.mrb[18].mxu0 %vm146_vm3, %v4517_v25 }
0x1e5c   :  { %3865 = vmatpush3.bf16.msra.mxu0 %v4327_v16  ;;  %3594 = vmatprep.mubr.msk.f32.mxu0 %vm4109_vm2, %v4110_v9 }
0x1e5d   :  { %3866 = vmatprep.subr.bf16.mxu0 %v4108_v3 }
0x1e60   :  { %3868 = vmatpush3.bf16.msra.mxu0 %v4340_v20  ;;  %v959_v20 = vrot.slane %v4441_v52, 2 }
0x1e61   :  { %3869 = vmatprep.subr.bf16.mxu0 %v4108_v3 }
0x1e62   :  { %v961_v39 = vadd.f32 %v959_v20, %v4234_v13 }
0x1e64   :  { %v3121_v42 = vmul.f32 -1.442695, %v961_v39 }
0x1f2e   :  { %v1990_v32 = vpop.f32.mrb[18].mxu0 }
0x1f2f   :  { %v3952_v28 = vadd.f32 %v4390_v12, %v1990_v32  ;;  %v3563_v29 = vpop.f32.mrb[19].mxu0 }
0x1f31   :  { %4072 = vtanh.f32 %v3952_v28  ;;  %v3139_v30 = vmul.f32 -1.442695, %v3952_v28 }
0x1f33   :  { %4074 = vpow2.f32 %v3139_v30 }
0x1f3b   :  { %v4073_v15 = vpop.eup %4072 }
0x1f3c   :  { %2004 = vrot.lane.b32.xlu0 %v4073_v15, %s4111_s21 }
0x1f3d   :  { %v4075_v16 = vpop.eup %4074 }
0x1f3e   :  { %v1998_v53 = vadd.f32 1.0, %v4075_v16 }
0x1f40   :  { %4076 = vrcp.f32 %v1998_v53 }
0x1f4a   :  { %v4077_v31 = vpop.eup %4076 }
0x1f4b   :  { %v2002_v36 = vmul.f32 %v4077_v31, %v1842_v18 }
0x1fae   :  { %v2005_v33 = vpop.permute.xlu0 %2004 }
0x1faf   :  { %v2007_v35 = vmul.f32 %v4077_v31, %v2005_v33 }
0x1fb1   :  { %2009 = vrot.lane.b32.xlu1 %v2007_v35, %s4111_s21 }
0x2023   :  { %v2010_v37 = vpop.permute.xlu1 %2009 }
0x2024   :  { %v4531_v38 = vadd.f32 %v2010_v37, %v2002_v36 }
0x2026   :  { %4078 = vtanh.f32 %v4531_v38 }
0x2027   :  { %4080 = vtanh.f32 %v961_v39 }
0x2028   :  { %4082 = vpow2.f32 %v3121_v42 }
0x2030   :  { %v4079_v40 = vpop.eup %4078 }
0x2031   :  { %2015 = vrot.lane.b32.xlu0 %v4079_v40, %s4111_s21  ;;  %v4081_v41 = vpop.eup %4080  ;;  %v2814_v40 = vld [vmem:[%s4801_s7 + $0xc8] sm:$0xff] }
0x2032   :  { %v4083_v43 = vpop.eup %4082 }
0x2033   :  { %v965_v45 = vadd.f32 1.0, %v4083_v43 }
0x2035   :  { %974 = vrot.lane.b32.xlu0 %v4081_v41, %s4111_s21  ;;  %4084 = vrcp.f32 %v965_v45  ;;  %v2815_v41 = vld [vmem:[%s4801_s7 + $0xd0] sm:$0xff] }
0x203f   :  { %v4085_v47 = vpop.eup %4084 }
0x2040   :  { %v972_v59 = vmul.f32 %v4085_v47, %v970_v57  ;;  %v2589_v57 = vld [vmem:[%s4801_s7 + $0x68] sm:$0xff] }
0x20a3   :  { %v2016_v52 = vpop.permute.xlu0 %2015 }
0x20a4   :  { %v2018_v46 = vmul.f32 %v4077_v31, %v2016_v52 }
0x20a6   :  { %2090 = vrot.lane.b32.xlu1 %v2018_v46, %s4112_s3 }
0x20a7   :  { %v975_v13 = vpop.permute.xlu0 %974 }
0x20a8   :  { %v977_v48 = vmul.f32 %v4085_v47, %v975_v13  ;;  %v2366_v13 = vld [vmem:[%s4801_s7 + $0x8] sm:$0xff] }
0x20aa   :  { %979 = vrot.lane.b32.xlu0 %v977_v48, %s4111_s21 }
0x2118   :  { %v4551_v56 = vpop.permute.xlu1 %2090 }
0x2119   :  { %3584 = vmatmul.mubr.msk.f32.vlgmr.msra.gmra.mrb[10].mxu1 %vm146_vm3, %v4551_v56 }
0x211a   :  { %3877 = vmatpush3.bf16.msra.mxu1 %v3876_v50  ;;  %3616 = vmatprep.mubr.msk.f32.mxu1 %vm4109_vm2, %v4110_v9 }
0x211b   :  { %3878 = vmatprep.subr.bf16.mxu1 %v4108_v3 }
0x211c   :  { %v980_v51 = vpop.permute.xlu0 %979 }
0x211d   :  { %v982_v61 = vadd.f32 %v980_v51, %v972_v59  ;;  %v2590_v59 = vld [vmem:[%s4801_s7 + $0x70] sm:$0xff]  ;;  %v2738_v51 = vld [vmem:[%s4801_s7 + $0xa0] sm:$0xff] }
0x211e   :  { %3880 = vmatpush3.bf16.msra.mxu1 %v3879_v58  ;;  %v3894_v58 = vpack.c.bf16 %v2589_v57, %v2588_v55  ;;  %v3897_v60 = vpack.c.bf16 %v2591_v7, %v2590_v59  ;;  %v2987_v55 = vld [vmem:[%s4802_s9 + $0x50] sm:$0xff]  ;;  %v2988_v57 = vld [vmem:[%s4802_s9 + $0x58] sm:$0xff]  ;;  %v2989_v7 = vld [vmem:[%s4802_s9 + $0x60] sm:$0xff] }
0x211f   :  { %4086 = vtanh.f32 %v982_v61  ;;  %3887 = vmatprep.subr.bf16.mxu1 %v4108_v3  ;;  %v2739_v61 = vld [vmem:[%s4801_s7 + $0xa8] sm:$0xff] }
0x2121   :  { %3617 = vmatmul.mubr.msk.f32.vlgmr.msra.gmra.mrb[12].mxu1 %vm146_vm3, %v4448_v27  ;;  %v2665_v27 = vld [vmem:[%s4801_s7 + $0x90] sm:$0xff] }
0x2122   :  { %3889 = vmatpush3.bf16.msra.mxu1 %v3888_v0  ;;  %3638 = vmatprep.mubr.msk.f32.mxu1 %vm4109_vm2, %v4110_v9  ;;  %v3903_v11 = vpack.c.bf16 %v2666_v6, %v2665_v27  ;;  %v3906_v0 = vpack.c.bf16 %v2739_v61, %v2738_v51  ;;  %v2991_v61 = vld [vmem:[%s4802_s9 + $0x70] sm:$0xff] }
0x2123   :  { %3890 = vmatprep.subr.bf16.mxu1 %v4108_v3 }
0x2126   :  { %3892 = vmatpush3.bf16.msra.mxu1 %v3891_v4 }
0x2127   :  { %3899 = vmatprep.subr.bf16.mxu1 %v4108_v3 }
0x2129   :  { %v4087_v8 = vpop.eup %4086  ;;  %3639 = vmatmul.mubr.msk.f32.vlgmr.msra.gmra.mrb[14].mxu1 %vm146_vm3, %v4471_v44 }
0x212a   :  { %3901 = vmatpush3.bf16.msra.mxu1 %v3900_v5  ;;  %985 = vrot.lane.b32.xlu0 %v4087_v8, %s4111_s21 }
0x212b   :  { %3902 = vmatprep.subr.bf16.mxu1 %v4108_v3  ;;  %3660 = vmatprep.mubr.msk.f32.mxu1 %vm4109_vm2, %v4110_v9 }
0x212e   :  { %3904 = vmatpush3.bf16.msra.mxu1 %v3903_v11 }
0x212f   :  { %3911 = vmatprep.subr.bf16.mxu1 %v4108_v3 }
0x2131   :  { %3661 = vmatmul.mubr.msk.f32.vlgmr.msra.gmra.mrb[16].mxu1 %vm146_vm3, %v4517_v25 }
0x2132   :  { %3682 = vmatprep.mubr.msk.f32.mxu1 %vm4109_vm2, %v4110_v9 }
0x219c   :  { %v986_v14 = vpop.permute.xlu0 %985 }
0x219d   :  { %v988_v44 = vmul.f32 %v4085_v47, %v986_v14  ;;  %v2365_v47 = vld [vmem:[%s4801_s7] sm:$0xff] }
0x219e   :  { %v3882_v48 = vpack.c.bf16 %v2366_v13, %v2365_v47  ;;  %v2984_v47 = vld [vmem:[%s4802_s9 + $0x38] sm:$0xff] }
0x219f   :  { %v2190_v17 = vrot.slane %v988_v44, 6 }
0x21a1   :  { %2191 = vrot.lane.b32.xlu0 %v2190_v17, %s4112_s3 }
0x21ec   :  { %v2160_v18 = vpop.f32.mrb[10].mxu1 }
0x21ed   :  { %v3953_v21 = vadd.f32 %v4390_v12, %v2160_v18  ;;  %v3585_v22 = vpop.f32.mrb[11].mxu1 }
0x21ef   :  { %4088 = vtanh.f32 %v3953_v21  ;;  %v3142_v53 = vmul.f32 -1.442695, %v3953_v21 }
0x21f1   :  { %4090 = vpow2.f32 %v3142_v53 }
0x21f4   :  { %v4603_v24 = vpop.f32.mrb[12].mxu1 }
0x21f5   :  { %v3618_v32 = vpop.f32.mrb[13].mxu1 }
0x21f9   :  { %v4089_v28 = vpop.eup %4088 }
0x21fa   :  { %2174 = vrot.lane.b32.xlu1 %v4089_v28, %s4111_s21 }
0x21fb   :  { %v4091_v31 = vpop.eup %4090 }
0x21fc   :  { %v4606_v25 = vpop.f32.mrb[14].mxu1  ;;  %v2168_v33 = vadd.f32 1.0, %v4091_v31 }
0x21fd   :  { %v3640_v29 = vpop.f32.mrb[15].mxu1 }
0x21fe   :  { %4092 = vrcp.f32 %v2168_v33  ;;  %v2889_v33 = vld [vmem:[%s4801_s7 + $0xe8] sm:$0xff] }
0x2204   :  { %v4608_v15 = vpop.f32.mrb[16].mxu1 }
0x2205   :  { %v3662_v30 = vpop.f32.mrb[17].mxu1 }
0x2208   :  { %v4093_v35 = vpop.eup %4092 }
0x2213   :  { %v2192_v16 = vpop.permute.xlu0 %2191 }
0x2214   :  { %3595 = vmatmul.mubr.msk.f32.vlgmr.msra.gmra.mrb[20].mxu0 %vm146_vm3, %v2192_v16 }
0x2215   :  { %3871 = vmatpush3.bf16.msra.mxu0 %v4352_v23  ;;  %3605 = vmatprep.mubr.msk.f32.mxu0 %vm4109_vm2, %v4110_v9  ;;  %v2172_v23 = vmul.f32 %v4093_v35, %v4531_v38  ;;  %v2816_v38 = vld [vmem:[%s4801_s7 + $0xd8] sm:$0xff] }
0x2216   :  { %3872 = vmatprep.subr.bf16.mxu0 %v4108_v3  ;;  %v3915_v43 = vpack.c.bf16 %v2816_v38, %v2815_v41 }
0x2219   :  { %3874 = vmatpush3.bf16.msra.mxu0 %v4364_v26  ;;  %v2813_v26 = vld [vmem:[%s4801_s7 + $0xc0] sm:$0xff] }
0x221a   :  { %3881 = vmatprep.subr.bf16.mxu0 %v4108_v3  ;;  %v3912_v42 = vpack.c.bf16 %v2814_v40, %v2813_v26  ;;  %v2978_v26 = vld [vmem:[%s4802_s9 + $0x8] sm:$0xff]  ;;  %v2979_v40 = vld [vmem:[%s4802_s9 + $0x10] sm:$0xff] }
0x221c   :  { %3913 = vmatpush3.bf16.msra.mxu1 %v3912_v42  ;;  %v2980_v42 = vld [vmem:[%s4802_s9 + $0x18] sm:$0xff] }
0x221d   :  { %3914 = vmatprep.subr.bf16.mxu1 %v4108_v3  ;;  %v3927_v38 = vpack.c.bf16 %v2980_v42, %v2979_v40 }
0x2220   :  { %3916 = vmatpush3.bf16.msra.mxu1 %v3915_v43  ;;  %v2981_v43 = vld [vmem:[%s4802_s9 + $0x20] sm:$0xff] }
0x2221   :  { %3923 = vmatprep.subr.bf16.mxu1 %v4108_v3 }
0x226c   :  { %v2175_v20 = vpop.permute.xlu1 %2174 }
0x226d   :  { %v2177_v36 = vmul.f32 %v4093_v35, %v2175_v20 }
0x226f   :  { %2179 = vrot.lane.b32.xlu1 %v2177_v36, %s4111_s21  ;;  %v2891_v36 = vld [vmem:[%s4801_s7 + $0xf8] sm:$0xff] }
0x22e1   :  { %v2180_v37 = vpop.permute.xlu1 %2179 }
0x22e2   :  { %v4619_v39 = vadd.f32 %v2180_v37, %v2172_v23 }
0x22e4   :  { %4094 = vtanh.f32 %v4619_v39 }
0x22ee   :  { %v4095_v45 = vpop.eup %4094 }
0x22ef   :  { %2185 = vrot.lane.b32.xlu1 %v4095_v45, %s4111_s21  ;;  %v2982_v45 = vld [vmem:[%s4802_s9 + $0x28] sm:$0xff] }
0x2361   :  { %v2186_v52 = vpop.permute.xlu1 %2185 }
0x2362   :  { %v2188_v46 = vmul.f32 %v4093_v35, %v2186_v52  ;;  %v2890_v35 = vld [vmem:[%s4801_s7 + $0xf0] sm:$0xff]  ;;  %v3930_v52 = vpack.c.bf16 %v2982_v45, %v2981_v43 }
0x2363   :  { %v3921_v23 = vpack.c.bf16 %v2891_v36, %v2890_v35 }
0x2364   :  { %2266 = vrot.lane.b32.xlu1 %v2188_v46, %s4112_s3  ;;  %v2983_v46 = vld [vmem:[%s4802_s9 + $0x30] sm:$0xff] }
0x2365   :  { %v3933_v19 = vpack.c.bf16 %v2984_v47, %v2983_v46 }
0x23d6   :  { %v2267_v50 = vpop.permute.xlu1 %2266 }
0x23d7   :  { %3606 = vmatmul.mubr.msk.f32.vlgmr.msra.gmra.mrb[20].mxu0 %vm146_vm3, %v2267_v50  ;;  %3683 = vmatmul.mubr.msk.f32.vlgmr.msra.gmra.mrb[18].mxu1 %vm146_vm3, %v2267_v50  ;;  %v2986_v50 = vld [vmem:[%s4802_s9 + $0x48] sm:$0xff] }
0x23d8   :  { %3883 = vmatpush3.bf16.msra.mxu0 %v3882_v48  ;;  %3627 = vmatprep.mubr.msk.f32.mxu0 %vm4109_vm2, %v4110_v9 }
0x23d9   :  { %3884 = vmatprep.subr.bf16.mxu0 %v4108_v3  ;;  %3728 = vmatprep.mubr.msk.f32.mxu1 %vm4109_vm2, %v4110_v9 }
0x23dc   :  { %3886 = vmatpush3.bf16.msra.mxu0 %v3885_v54  ;;  %v3936_v54 = vpack.c.bf16 %v2986_v50, %v2985_v49 }
0x23dd   :  { %3893 = vmatprep.subr.bf16.mxu0 %v4108_v3 }
0x23df   :  { %3628 = vmatmul.mubr.msk.f32.vlgmr.msra.gmra.mrb[22].mxu0 %vm146_vm3, %v4423_v10  ;;  %v2740_v10 = vld [vmem:[%s4801_s7 + $0xb0] sm:$0xff] }
0x23e0   :  { %3895 = vmatpush3.bf16.msra.mxu0 %v3894_v58  ;;  %3649 = vmatprep.mubr.msk.f32.mxu0 %vm4109_vm2, %v4110_v9  ;;  %v3909_v2 = vpack.c.bf16 %v2741_v1, %v2740_v10  ;;  %v3939_v58 = vpack.c.bf16 %v2988_v57, %v2987_v55 }
0x23e1   :  { %3896 = vmatprep.subr.bf16.mxu0 %v4108_v3 }
0x23e4   :  { %3898 = vmatpush3.bf16.msra.mxu0 %v3897_v60  ;;  %v2990_v60 = vld [vmem:[%s4802_s9 + $0x68] sm:$0xff] }
0x23e5   :  { %3905 = vmatprep.subr.bf16.mxu0 %v4108_v3  ;;  %v3942_v51 = vpack.c.bf16 %v2990_v60, %v2989_v7 }
0x23e7   :  { %3650 = vmatmul.mubr.msk.f32.vlgmr.msra.gmra.mrb[24].mxu0 %vm146_vm3, %v4494_v62 }
0x23e8   :  { %3907 = vmatpush3.bf16.msra.mxu0 %v3906_v0  ;;  %3671 = vmatprep.mubr.msk.f32.mxu0 %vm4109_vm2, %v4110_v9  ;;  %v2992_v0 = vld [vmem:[%s4802_s9 + $0x78] sm:$0xff] }
0x23e9   :  { %3908 = vmatprep.subr.bf16.mxu0 %v4108_v3  ;;  %v3945_v10 = vpack.c.bf16 %v2992_v0, %v2991_v61 }
0x23ec   :  { %3910 = vmatpush3.bf16.msra.mxu0 %v3909_v2  ;;  %v3154_v2 = vld [vmem:[%s4803_s8] ss:$0 sm:$0xff] }
0x23ed   :  { %3917 = vmatprep.subr.bf16.mxu0 %v4108_v3 }
0x23ef   :  { %3672 = vmatmul.mubr.msk.f32.vlgmr.msra.gmra.mrb[26].mxu0 %vm146_vm3, %v4551_v56 }
0x23f0   :  { %3693 = vmatprep.mubr.msk.f32.mxu0 %vm4109_vm2, %v4110_v9 }
0x24aa   :  { %v2336_v4 = vpop.f32.mrb[20].mxu0  ;;  %v2883_v63 = vpop.f32.mrb[18].mxu1 }
0x24ab   :  { %v3954_v62 = vadd.f32 %v4390_v12, %v2336_v4  ;;  %v3607_v34 = vpop.f32.mrb[21].mxu0  ;;  %v3684_v5 = vpop.f32.mrb[19].mxu1 }
0x24ac   :  { %v18_v34 = vstv %s4804_s12  ;;  %v3155_v5 = vld [vmem:[%s4805_s10] ss:$0 sm:$0xff] }
0x24ad   :  { %4096 = vtanh.f32 %v3954_v62  ;;  %v3145_v32 = vmul.f32 -1.442695, %v3954_v62  ;;  %19 = vst [vmem:[#allocation2] sm:$0x1] %v18_v34 }
0x24af   :  { %4098 = vpow2.f32 %v3145_v32 }
0x24b2   :  { %v2509_v27 = vpop.f32.mrb[22].mxu0 }
0x24b3   :  { %v2510_v6 = vadd.f32 %v2509_v27, %v4603_v24  ;;  %v3629_v8 = vpop.f32.mrb[23].mxu0 }
0x24b5   :  { %v2587_v11 = vadd.f32 %v4606_v25, %v2510_v6 }
0x24b7   :  { %v4097_v14 = vpop.eup %4096 }
0x24b8   :  { %2350 = vrot.lane.b32.xlu0 %v4097_v14, %s4111_s21 }
0x24b9   :  { %v4099_v28 = vpop.eup %4098 }
0x24ba   :  { %v2658_v56 = vpop.f32.mrb[24].mxu0  ;;  %v2344_v24 = vadd.f32 1.0, %v4099_v28 }
0x24bb   :  { %v2662_v44 = vadd.f32 %v2658_v56, %v2587_v11  ;;  %v3651_v17 = vpop.f32.mrb[25].mxu0  ;;  %v3156_v11 = vld [vmem:[%s4806_s11] ss:$0 sm:$0xff] }
0x24bc   :  { %4100 = vrcp.f32 %v2344_v24  ;;  %v3157_v17 = vld [vmem:[#allocation2] ss:$0 sm:$0xff] }
0x24bd   :  { %v2737_v9 = vadd.f32 %v4608_v15, %v2662_v44  ;;  %v2888_v15 = vld [vmem:[%s4801_s7 + $0xe0] sm:$0xff] }
0x24be   :  { %v3918_v20 = vpack.c.bf16 %v2889_v33, %v2888_v15 }
0x24c0   :  { %3919 = vmatpush3.bf16.msra.mxu0 %v3918_v20 }
0x24c1   :  { %3920 = vmatprep.subr.bf16.mxu0 %v4108_v3 }
0x24c2   :  { %v2808_v18 = vpop.f32.mrb[26].mxu0 }
0x24c3   :  { %v2812_v21 = vadd.f32 %v2808_v18, %v2737_v9  ;;  %v3673_v12 = vpop.f32.mrb[27].mxu0 }
0x24c4   :  { %3922 = vmatpush3.bf16.msra.mxu0 %v3921_v23 }
0x24c5   :  { %v4703_v22 = vadd.f32 %v2883_v63, %v2812_v21 }
0x24c6   :  { %v4101_v29 = vpop.eup %4100 }
0x24c7   :  { %v2348_v16 = vmul.f32 %v4101_v29, %v4619_v39  ;;  %v2977_v39 = vld [vmem:[%s4802_s9] sm:$0xff] }
0x24c8   :  { %v3924_v41 = vpack.c.bf16 %v2978_v26, %v2977_v39 }
0x24ca   :  { %3925 = vmatpush3.bf16.msra.mxu1 %v3924_v41 }
0x24cb   :  { %3926 = vmatprep.subr.bf16.mxu1 %v4108_v3 }
0x24ce   :  { %3928 = vmatpush3.bf16.msra.mxu1 %v3927_v38 }
0x24cf   :  { %3929 = vmatprep.subr.bf16.mxu1 %v4108_v3 }
0x24d2   :  { %3931 = vmatpush3.bf16.msra.mxu1 %v3930_v52 }
0x24d3   :  { %3932 = vmatprep.subr.bf16.mxu1 %v4108_v3 }
0x24d6   :  { %3934 = vmatpush3.bf16.msra.mxu1 %v3933_v19 }
0x24d7   :  { %3935 = vmatprep.subr.bf16.mxu1 %v4108_v3 }
0x24da   :  { %3937 = vmatpush3.bf16.msra.mxu1 %v3936_v54 }
0x24db   :  { %3938 = vmatprep.subr.bf16.mxu1 %v4108_v3 }
0x24de   :  { %3940 = vmatpush3.bf16.msra.mxu1 %v3939_v58 }
0x24df   :  { %3941 = vmatprep.subr.bf16.mxu1 %v4108_v3 }
0x24e2   :  { %3943 = vmatpush3.bf16.msra.mxu1 %v3942_v51 }
0x24e3   :  { %3944 = vmatprep.subr.bf16.mxu1 %v4108_v3 }
0x24e6   :  { %3946 = vmatpush3.bf16.msra.mxu1 %v3945_v10 }
0x252a   :  { %v2351_v25 = vpop.permute.xlu0 %2350 }
0x252b   :  { %v2353_v30 = vmul.f32 %v4101_v29, %v2351_v25 }
0x252d   :  { %2355 = vrot.lane.b32.xlu1 %v2353_v30, %s4111_s21 }
0x259f   :  { %v2356_v53 = vpop.permute.xlu1 %2355 }
0x25a0   :  { %v2358_v31 = vadd.f32 %v2356_v53, %v2348_v16 }
0x25a2   :  { %4102 = vtanh.f32 %v2358_v31 }
0x25ac   :  { %v4103_v37 = vpop.eup %4102 }
0x25ad   :  { %2361 = vrot.lane.b32.xlu0 %v4103_v37, %s4111_s21 }
0x261f   :  { %v2362_v13 = vpop.permute.xlu0 %2361 }
0x2620   :  { %v2364_v48 = vmul.f32 %v4101_v29, %v2362_v13 }
0x2622   :  { %2893 = vrot.lane.b32.xlu1 %v2364_v48, %s4112_s3 }
0x2694   :  { %v2894_v59 = vpop.permute.xlu1 %2893 }
0x2695   :  { %3694 = vmatmul.mubr.msk.f32.vlgmr.msra.gmra.mrb[28].mxu0 %vm146_vm3, %v2894_v59 }
0x2768   :  { %v2963_v1 = vpop.f32.mrb[28].mxu0 }
0x2769   :  { %v2967_v4 = vadd.f32 %v2963_v1, %v4703_v22  ;;  %v3695_v63 = vpop.f32.mrb[29].mxu0 }
0x276b   :  { %v2975_v62 = vadd.f32 %v3154_v2, %v2967_v4 }
0x276d   :  { %v2976_v3 = vmax.f32 %v2975_v62, 0.0 }
0x276f   :  { %3729 = vmatmul.mubr.f32.vlgmr.msra.gmra.mrb[20].mxu1 %v2976_v3 }
0x2842   :  { %v3066_v27 = vpop.f32.mrb[20].mxu1 }
0x2843   :  { %v3067_v6 = vadd.f32 %v3155_v5, %v3066_v27  ;;  %v3730_v8 = vpop.f32.mrb[21].mxu1 }
0x2845   :  { %v3070_v14 = vmax.f32 %v3067_v6, 0.0 }
0x2847   :  { %v3078_v56 = vmul.f32 %v3156_v11, %v3070_v14 }
0x2849   :  { %v3080_v44 = vsel %vm3079_vm4, %v3078_v56, 0.0 }
0x284a   :  { %3081 = vadd.xlane.f32.xlu0 %v3080_v44 }
0x28d7   :  { %v3082_v9 = vpop.xlane.xlu0 %3081 }
0x28d8   :  { %v3090_v18 = vadd.f32 %v3157_v17, %v3082_v9 }
0x28da   :  { %v3158_v21 = vmul.f32 -1.442695, %v3090_v18 }
0x28dc   :  { %4104 = vpow2.f32 %v3158_v21 }
0x28e6   :  { %v4105_v12 = vpop.eup %4104 }
0x28e7   :  { %v3094_v22 = vadd.f32 1.0, %v4105_v12 }
0x28e9   :  { %4106 = vrcp.f32 %v3094_v22 }
0x28f3   :  { %v4107_v32 = vpop.eup %4106 }
0x28f4   :  { %3098 = vst.msk [vmem:[%s4807_s13] sm:$0x3] %vm3097_vm5, %v4107_v32 }

</bundles_post_ra>
